<compile_context>
chip_gen: v7x
topology: tpu7x:2x2x1
jax: 0.10.0
libtpu: 0.0.40
codegen_flags: <defaults>
</compile_context>

<pallas_src>
import math
from functools import partial

import jax
import jax.numpy as jnp
from jax.experimental import pallas as pl
from jax.experimental.pallas import tpu as pltpu

EPS = 1e-6                      # LayerNorm eps (matches the PyTorch module default)
MM_DTYPE = jnp.bfloat16         # matmul-input dtype (f32 accumulation via preferred_element_type)
VMEM_LIMIT = 32 * 1024 * 1024   # safe scoped-VMEM budget on v5e/v6e/v7x


# ----------------------------- in-kernel helpers ----------------------------

def _layernorm_f32(x, a, b):
    # Matches PyTorch module: mean over last dim, unbiased std (ddof=1),
    # (x - mean) / sqrt(std**2 + eps), then a_2 * xz + b_2.
    n = x.shape[-1]
    mean = jnp.mean(x, axis=-1, keepdims=True)
    diff = x - mean
    var_unbiased = jnp.sum(diff * diff, axis=-1, keepdims=True) * (1.0 / (n - 1))
    return a * (diff * jax.lax.rsqrt(var_unbiased + EPS)) + b


def _mha_core(q, k, v, mask, h, dk, scale):
    # q: (T, h*dk) f32, k/v: (S, h*dk) f32, mask: (T, S) or (1, S) int32.
    # Static per-head loop with 2-D MXU matmuls (robust lowering); all heads handled in
    # this single grid step, and the concatenated (T, D) context keeps stores lane-dense.
    # TODO(synk): for long source/target lengths convert to an online-softmax (flash)
    # form with a kv-tile grid axis instead of holding full (T, S) scores per head.
    neg = jnp.float32(-1e9)
    ctx = []
    for i in range(h):
        qh = q[:, i * dk:(i + 1) * dk]
        kh = k[:, i * dk:(i + 1) * dk]
        vh = v[:, i * dk:(i + 1) * dk]
        s = jax.lax.dot_general(qh.astype(MM_DTYPE), kh.astype(MM_DTYPE),
                                (((1,), (1,)), ((), ())),
                                preferred_element_type=jnp.float32) * scale
        s = jnp.where(mask == 0, neg, s)           # masked_fill(mask == 0, -1e9)
        m = jnp.max(s, axis=-1, keepdims=True)
        e = jnp.exp(s - m)
        denom = jnp.sum(e, axis=-1, keepdims=True)
        p = e * pl.reciprocal(denom, approx=True)  # EUP reciprocal: frees the VALU divide
        ctx.append(jnp.dot(p.astype(MM_DTYPE), vh.astype(MM_DTYPE),
                           preferred_element_type=jnp.float32))
    return jnp.concatenate(ctx, axis=-1)           # (T, h*dk) — lane-dense


# ------------------------------- Pallas kernels ------------------------------

def _self_attn_sublayer_kernel(x_ref, mask_ref, a_ref, b_ref,
                               wqkv_ref, bqkv_ref, wo_ref, bo_ref, o_ref, *, h, dk):
    # x + SelfAttn(LN(x)) for one batch element, all heads, fully fused.
    x = x_ref[0].astype(jnp.float32)                              # (T, D)
    D = x.shape[-1]
    nx = _layernorm_f32(x, a_ref[...].astype(jnp.float32), b_ref[...].astype(jnp.float32))
    qkv = jnp.dot(nx.astype(MM_DTYPE), wqkv_ref[...],             # fused (D, 3D) projection
                  preferred_element_type=jnp.float32) + bqkv_ref[...]
    q, k, v = qkv[:, :D], qkv[:, D:2 * D], qkv[:, 2 * D:]
    ctx = _mha_core(q, k, v, mask_ref[0], h, dk, 1.0 / math.sqrt(dk))
    out = jnp.dot(ctx.astype(MM_DTYPE), wo_ref[...],
                  preferred_element_type=jnp.float32) + bo_ref[...]
    o_ref[0] = (x + out).astype(o_ref.dtype)


def _cross_attn_sublayer_kernel(x_ref, mem_ref, mask_ref, a_ref, b_ref,
                                wq_ref, bq_ref, wkv_ref, bkv_ref, wo_ref, bo_ref,
                                o_ref, *, h, dk):
    # x + CrossAttn(LN(x), memory) for one batch element, all heads, fully fused.
    x = x_ref[0].astype(jnp.float32)                              # (T, D)
    mem = mem_ref[0].astype(jnp.float32)                          # (S, D)
    D = x.shape[-1]
    nx = _layernorm_f32(x, a_ref[...].astype(jnp.float32), b_ref[...].astype(jnp.float32))
    q = jnp.dot(nx.astype(MM_DTYPE), wq_ref[...],
                preferred_element_type=jnp.float32) + bq_ref[...]
    kv = jnp.dot(mem.astype(MM_DTYPE), wkv_ref[...],              # fused (D, 2D) projection
                 preferred_element_type=jnp.float32) + bkv_ref[...]
    k, v = kv[:, :D], kv[:, D:]
    ctx = _mha_core(q, k, v, mask_ref[0], h, dk, 1.0 / math.sqrt(dk))
    out = jnp.dot(ctx.astype(MM_DTYPE), wo_ref[...],
                  preferred_element_type=jnp.float32) + bo_ref[...]
    o_ref[0] = (x + out).astype(o_ref.dtype)


def _ffn_sublayer_kernel(x_ref, a_ref, b_ref, w1_ref, b1_ref, w2_ref, b2_ref, o_ref):
    # x + W2(relu(W1(LN(x)))) on a row tile (tm, D).
    x = x_ref[...].astype(jnp.float32)
    nx = _layernorm_f32(x, a_ref[...].astype(jnp.float32), b_ref[...].astype(jnp.float32))
    hid = jnp.dot(nx.astype(MM_DTYPE), w1_ref[...],
                  preferred_element_type=jnp.float32) + b1_ref[...]
    hid = jnp.maximum(hid, 0.0)
    out = jnp.dot(hid.astype(MM_DTYPE), w2_ref[...],
                  preferred_element_type=jnp.float32) + b2_ref[...]
    o_ref[...] = (x + out).astype(o_ref.dtype)


def _final_ln_kernel(x_ref, a_ref, b_ref, o_ref):
    x = x_ref[...].astype(jnp.float32)
    o_ref[...] = _layernorm_f32(
        x, a_ref[...].astype(jnp.float32), b_ref[...].astype(jnp.float32)).astype(o_ref.dtype)


# ------------------------------- host wrappers -------------------------------

def _row_tile(rows, target=256):
    # Row tiling for row-parallel kernels. For larger d_model/d_ff a K-tiled
    # accumulator grid (P1+P3) would be added; at these sizes full-K blocks fit VMEM.
    if rows <= target:
        return rows, 1
    tm = (target // 8) * 8
    return tm, pl.cdiv(rows, tm)


def self_attn_sublayer(x, tgt_mask_i, ln, wqkv, bqkv, wo, bo, h):
    B, T, D = x.shape
    dk = D // h
    return pl.pallas_call(
        partial(_self_attn_sublayer_kernel, h=h, dk=dk),
        grid=(B,),
        in_specs=[
            pl.BlockSpec((1, T, D), lambda b: (b, 0, 0)),
            pl.BlockSpec((1, T, T), lambda b: (b, 0, 0)),
            pl.BlockSpec((1, D), lambda b: (0, 0)),
            pl.BlockSpec((1, D), lambda b: (0, 0)),
            pl.BlockSpec((D, 3 * D), lambda b: (0, 0)),
            pl.BlockSpec((1, 3 * D), lambda b: (0, 0)),
            pl.BlockSpec((D, D), lambda b: (0, 0)),
            pl.BlockSpec((1, D), lambda b: (0, 0)),
        ],
        out_specs=pl.BlockSpec((1, T, D), lambda b: (b, 0, 0)),
        out_shape=jax.ShapeDtypeStruct((B, T, D), x.dtype),
        compiler_params=pltpu.CompilerParams(
            dimension_semantics=("parallel",), vmem_limit_bytes=VMEM_LIMIT),
    )(x, tgt_mask_i, ln["a"].reshape(1, D), ln["b"].reshape(1, D),
      wqkv, bqkv.reshape(1, 3 * D), wo, bo.reshape(1, D))


def cross_attn_sublayer(x, memory, src_mask_i, ln, wq, bq, wkv, bkv, wo, bo, h):
    B, T, D = x.shape
    S = memory.shape[1]
    dk = D // h
    return pl.pallas_call(
        partial(_cross_attn_sublayer_kernel, h=h, dk=dk),
        grid=(B,),
        in_specs=[
            pl.BlockSpec((1, T, D), lambda b: (b, 0, 0)),
            pl.BlockSpec((1, S, D), lambda b: (b, 0, 0)),
            pl.BlockSpec((1, 1, S), lambda b: (b, 0, 0)),
            pl.BlockSpec((1, D), lambda b: (0, 0)),
            pl.BlockSpec((1, D), lambda b: (0, 0)),
            pl.BlockSpec((D, D), lambda b: (0, 0)),
            pl.BlockSpec((1, D), lambda b: (0, 0)),
            pl.BlockSpec((D, 2 * D), lambda b: (0, 0)),
            pl.BlockSpec((1, 2 * D), lambda b: (0, 0)),
            pl.BlockSpec((D, D), lambda b: (0, 0)),
            pl.BlockSpec((1, D), lambda b: (0, 0)),
        ],
        out_specs=pl.BlockSpec((1, T, D), lambda b: (b, 0, 0)),
        out_shape=jax.ShapeDtypeStruct((B, T, D), x.dtype),
        compiler_params=pltpu.CompilerParams(
            dimension_semantics=("parallel",), vmem_limit_bytes=VMEM_LIMIT),
    )(x, memory, src_mask_i, ln["a"].reshape(1, D), ln["b"].reshape(1, D),
      wq, bq.reshape(1, D), wkv, bkv.reshape(1, 2 * D), wo, bo.reshape(1, D))


def ffn_sublayer(x, ln, w1, b1, w2, b2):
    B, T, D = x.shape
    d_ff = w1.shape[1]
    rows = B * T
    x2 = x.reshape(rows, D)
    tm, gm = _row_tile(rows)
    out = pl.pallas_call(
        _ffn_sublayer_kernel,
        grid=(gm,),
        in_specs=[
            pl.BlockSpec((tm, D), lambda i: (i, 0)),
            pl.BlockSpec((1, D), lambda i: (0, 0)),
            pl.BlockSpec((1, D), lambda i: (0, 0)),
            pl.BlockSpec((D, d_ff), lambda i: (0, 0)),
            pl.BlockSpec((1, d_ff), lambda i: (0, 0)),
            pl.BlockSpec((d_ff, D), lambda i: (0, 0)),
            pl.BlockSpec((1, D), lambda i: (0, 0)),
        ],
        out_specs=pl.BlockSpec((tm, D), lambda i: (i, 0)),
        out_shape=jax.ShapeDtypeStruct((rows, D), x.dtype),
        compiler_params=pltpu.CompilerParams(
            dimension_semantics=("parallel",), vmem_limit_bytes=VMEM_LIMIT),
    )(x2, ln["a"].reshape(1, D), ln["b"].reshape(1, D),
      w1, b1.reshape(1, d_ff), w2, b2.reshape(1, D))
    return out.reshape(B, T, D)


def final_layernorm(x, a, b):
    B, T, D = x.shape
    rows = B * T
    x2 = x.reshape(rows, D)
    tm, gm = _row_tile(rows)
    out = pl.pallas_call(
        _final_ln_kernel,
        grid=(gm,),
        in_specs=[
            pl.BlockSpec((tm, D), lambda i: (i, 0)),
            pl.BlockSpec((1, D), lambda i: (0, 0)),
            pl.BlockSpec((1, D), lambda i: (0, 0)),
        ],
        out_specs=pl.BlockSpec((tm, D), lambda i: (i, 0)),
        out_shape=jax.ShapeDtypeStruct((rows, D), x.dtype),
        compiler_params=pltpu.CompilerParams(
            dimension_semantics=("parallel",), vmem_limit_bytes=VMEM_LIMIT),
    )(x2, a.reshape(1, D), b.reshape(1, D))
    return out.reshape(B, T, D)


# --------------------------------- model glue --------------------------------

def decoder_layer_forward(p, x, memory, src_mask_i, tgt_mask_i, h):
    # TODO(synk): dropout inside SublayerConnection / attention / FFN is identity here
    # (deterministic eval-mode forward).
    sa = p["self_attn"]
    x = self_attn_sublayer(x, tgt_mask_i, p["ln"][0],
                           sa["wqkv"], sa["bqkv"], sa["wo"], sa["bo"], h)
    ca = p["src_attn"]
    x = cross_attn_sublayer(x, memory, src_mask_i, p["ln"][1],
                            ca["wq"], ca["bq"], ca["wkv"], ca["bkv"], ca["wo"], ca["bo"], h)
    ff = p["ff"]
    x = ffn_sublayer(x, p["ln"][2], ff["w1"], ff["b1"], ff["w2"], ff["b2"])
    return x


def decoder_forward(params, x, memory, src_mask, tgt_mask, h):
    B, T, _ = x.shape
    S = memory.shape[1]
    # Compact int masks, indexed per batch via BlockSpec (no (B*h, T, S) f32 broadcast).
    tgt_mask_i = (tgt_mask.reshape(B, T, T) != 0).astype(jnp.int32)
    src_mask_i = (src_mask.reshape(B, 1, S) != 0).astype(jnp.int32)
    for p in params["layers"]:
        x = decoder_layer_forward(p, x, memory, src_mask_i, tgt_mask_i, h)
    return final_layernorm(x, params["norm"]["a"], params["norm"]["b"])


# ------------------------------ deterministic init ----------------------------

def _init_linear(key, d_in, d_out):
    kw, kb = jax.random.split(key)
    w = jax.random.normal(kw, (d_in, d_out), jnp.float32) * (1.0 / math.sqrt(d_in))
    b = jax.random.normal(kb, (d_out,), jnp.float32) * 0.02
    return {"w": w, "b": b}


def _init_mha_self(key, d_model):
    ks = jax.random.split(key, 4)
    lin = {n: _init_linear(k, d_model, d_model) for n, k in zip(("q", "k", "v", "o"), ks)}
    return {  # weights stored bf16 for MXU inputs / halved weight DMA; biases stay f32
        "wqkv": jnp.concatenate([lin["q"]["w"], lin["k"]["w"], lin["v"]["w"]], axis=1).astype(MM_DTYPE),
        "bqkv": jnp.concatenate([lin["q"]["b"], lin["k"]["b"], lin["v"]["b"]]),
        "wo": lin["o"]["w"].astype(MM_DTYPE), "bo": lin["o"]["b"],
    }


def _init_mha_cross(key, d_model):
    ks = jax.random.split(key, 4)
    lin = {n: _init_linear(k, d_model, d_model) for n, k in zip(("q", "k", "v", "o"), ks)}
    return {
        "wq": lin["q"]["w"].astype(MM_DTYPE), "bq": lin["q"]["b"],
        "wkv": jnp.concatenate([lin["k"]["w"], lin["v"]["w"]], axis=1).astype(MM_DTYPE),
        "bkv": jnp.concatenate([lin["k"]["b"], lin["v"]["b"]]),
        "wo": lin["o"]["w"].astype(MM_DTYPE), "bo": lin["o"]["b"],
    }


def _init_layer(key, d_model, d_ff):
    k1, k2, k3, k4 = jax.random.split(key, 4)
    ff1 = _init_linear(k3, d_model, d_ff)
    ff2 = _init_linear(k4, d_ff, d_model)
    return {
        "self_attn": _init_mha_self(k1, d_model),
        "src_attn": _init_mha_cross(k2, d_model),
        "ff": {"w1": ff1["w"].astype(MM_DTYPE), "b1": ff1["b"],
               "w2": ff2["w"].astype(MM_DTYPE), "b2": ff2["b"]},
        # LayerNorm params init exactly as the PyTorch module: a_2 = ones, b_2 = zeros
        "ln": [{"a": jnp.ones((d_model,), jnp.float32),
                "b": jnp.zeros((d_model,), jnp.float32)} for _ in range(3)],
    }


def init_decoder(key, n_layers, d_model, d_ff):
    keys = jax.random.split(key, n_layers)
    return {
        "layers": [_init_layer(k, d_model, d_ff) for k in keys],
        "norm": {"a": jnp.ones((d_model,), jnp.float32),
                 "b": jnp.zeros((d_model,), jnp.float32)},
    }


# ------------------------------------- main -----------------------------------

if __name__ == "__main__":
    B, T, S, D, H, D_FF, N_LAYERS = 2, 8, 8, 32, 4, 64, 2

    kx, km = jax.random.split(jax.random.PRNGKey(0))
    x = jax.random.normal(kx, (B, T, D), jnp.float32)        # target-side activations
    memory = jax.random.normal(km, (B, S, D), jnp.float32)   # encoder output
    src_mask = jnp.ones((B, 1, 1, S), jnp.float32)           # all source positions visible
    tgt_mask = jnp.tril(jnp.ones((T, T), jnp.float32))[None, None]  # causal mask
    tgt_mask = jnp.broadcast_to(tgt_mask, (B, 1, T, T))

    params = init_decoder(jax.random.PRNGKey(42), N_LAYERS, D, D_FF)

    fwd = jax.jit(partial(decoder_forward, h=H))
    out = fwd(params, x, memory, src_mask, tgt_mask)
    out = jax.block_until_ready(out)

    assert out.shape == (B, T, D)
    assert bool(jnp.all(jnp.isfinite(out)))
    print("KERNEL_OK")
</pallas_src>

<mosaic_0001>
module attributes {stable_mosaic.version = 11 : i64} {
  func.func @_self_attn_sublayer_kernel(%arg0: i32, %arg1: memref<1x8x32xf32, #tpu.memory_space<vmem>>, %arg2: memref<1x8x8xi32, #tpu.memory_space<vmem>>, %arg3: memref<1x32xf32, #tpu.memory_space<vmem>>, %arg4: memref<1x32xf32, #tpu.memory_space<vmem>>, %arg5: memref<32x96xbf16, #tpu.memory_space<vmem>>, %arg6: memref<1x96xf32, #tpu.memory_space<vmem>>, %arg7: memref<32x32xbf16, #tpu.memory_space<vmem>>, %arg8: memref<1x32xf32, #tpu.memory_space<vmem>>, %arg9: memref<1x8x32xf32, #tpu.memory_space<vmem>>) attributes {dimension_semantics = [#tpu.dimension_semantics<parallel>], iteration_bounds = array<i64: 2>, scalar_prefetch = 0 : i64, scratch_operands = 0 : i64, tpu.core_type = #tpu.core_type<tc>, window_params = [{transform_indices = @transform_0, window_bounds = array<i64: 1, 8, 32>}, {transform_indices = @transform_1, window_bounds = array<i64: 1, 8, 8>}, {pipeline_mode = #tpu.pipeline_mode<synchronous>, transform_indices = @transform_2, window_bounds = array<i64: 1, 32>}, {pipeline_mode = #tpu.pipeline_mode<synchronous>, transform_indices = @transform_3, window_bounds = array<i64: 1, 32>}, {pipeline_mode = #tpu.pipeline_mode<synchronous>, transform_indices = @transform_4, window_bounds = array<i64: 32, 96>}, {pipeline_mode = #tpu.pipeline_mode<synchronous>, transform_indices = @transform_5, window_bounds = array<i64: 1, 96>}, {pipeline_mode = #tpu.pipeline_mode<synchronous>, transform_indices = @transform_6, window_bounds = array<i64: 32, 32>}, {pipeline_mode = #tpu.pipeline_mode<synchronous>, transform_indices = @transform_7, window_bounds = array<i64: 1, 32>}, {transform_indices = @transform_8, window_bounds = array<i64: 1, 8, 32>}]} {
    %c0 = arith.constant 0 : index
    %c0_0 = arith.constant 0 : index
    %c0_1 = arith.constant 0 : index
    %0 = vector.load %arg1[%c0, %c0_0, %c0_1] : memref<1x8x32xf32, #tpu.memory_space<vmem>>, vector<1x8x32xf32>
    %1 = vector.shape_cast %0 : vector<1x8x32xf32> to vector<8x32xf32>
    %c0_2 = arith.constant 0 : index
    %c0_3 = arith.constant 0 : index
    %2 = vector.load %arg3[%c0_2, %c0_3] : memref<1x32xf32, #tpu.memory_space<vmem>>, vector<1x32xf32>
    %c0_4 = arith.constant 0 : index
    %c0_5 = arith.constant 0 : index
    %3 = vector.load %arg4[%c0_4, %c0_5] : memref<1x32xf32, #tpu.memory_space<vmem>>, vector<1x32xf32>
    %cst = arith.constant dense<0.000000e+00> : vector<8xf32>
    %4 = vector.multi_reduction <add>, %1, %cst [1] : vector<8x32xf32> to vector<8xf32>
    %5 = vector.shape_cast %4 : vector<8xf32> to vector<8x1xf32>
    %cst_6 = arith.constant 3.200000e+01 : f32
    %6 = vector.broadcast %cst_6 : f32 to vector<8x1xf32>
    %7 = arith.divf %5, %6 : vector<8x1xf32>
    %8 = vector.broadcast %7 : vector<8x1xf32> to vector<8x32xf32>
    %9 = arith.subf %1, %8 : vector<8x32xf32>
    %10 = arith.mulf %9, %9 : vector<8x32xf32>
    %cst_7 = arith.constant dense<0.000000e+00> : vector<8xf32>
    %11 = vector.multi_reduction <add>, %10, %cst_7 [1] : vector<8x32xf32> to vector<8xf32>
    %12 = vector.shape_cast %11 : vector<8xf32> to vector<8x1xf32>
    %cst_8 = arith.constant 0.0322580636 : f32
    %13 = vector.broadcast %cst_8 : f32 to vector<8x1xf32>
    %14 = arith.mulf %12, %13 : vector<8x1xf32>
    %cst_9 = arith.constant 9.99999997E-7 : f32
    %15 = vector.broadcast %cst_9 : f32 to vector<8x1xf32>
    %16 = arith.addf %14, %15 : vector<8x1xf32>
    %17 = math.rsqrt %16 : vector<8x1xf32>
    %18 = vector.broadcast %17 : vector<8x1xf32> to vector<8x32xf32>
    %19 = arith.mulf %9, %18 : vector<8x32xf32>
    %20 = vector.broadcast %2 : vector<1x32xf32> to vector<8x32xf32>
    %21 = arith.mulf %20, %19 : vector<8x32xf32>
    %22 = vector.broadcast %3 : vector<1x32xf32> to vector<8x32xf32>
    %23 = arith.addf %21, %22 : vector<8x32xf32>
    %24 = arith.truncf %23 : vector<8x32xf32> to vector<8x32xbf16>
    %c0_10 = arith.constant 0 : index
    %c0_11 = arith.constant 0 : index
    %25 = vector.load %arg5[%c0_10, %c0_11] : memref<32x96xbf16, #tpu.memory_space<vmem>>, vector<32x96xbf16>
    %cst_12 = arith.constant dense<0.000000e+00> : vector<8x96xf32>
    %26 = tpu.matmul %24, %25, %cst_12 {dimension_numbers = #tpu.dot_dimension_numbers<[1], [0], [0], [1], [0, 0, 1, 1], [], []>} : vector<8x32xbf16>, vector<32x96xbf16>, vector<8x96xf32> -> vector<8x96xf32>
    %c0_13 = arith.constant 0 : index
    %c0_14 = arith.constant 0 : index
    %27 = vector.load %arg6[%c0_13, %c0_14] : memref<1x96xf32, #tpu.memory_space<vmem>>, vector<1x96xf32>
    %28 = vector.broadcast %27 : vector<1x96xf32> to vector<8x96xf32>
    %29 = arith.addf %26, %28 : vector<8x96xf32>
    %30 = vector.extract_strided_slice %29 {offsets = [0, 0], sizes = [8, 32], strides = [1, 1]} : vector<8x96xf32> to vector<8x32xf32>
    %31 = vector.extract_strided_slice %29 {offsets = [0, 32], sizes = [8, 32], strides = [1, 1]} : vector<8x96xf32> to vector<8x32xf32>
    %32 = vector.extract_strided_slice %29 {offsets = [0, 64], sizes = [8, 32], strides = [1, 1]} : vector<8x96xf32> to vector<8x32xf32>
    %c0_15 = arith.constant 0 : index
    %c0_16 = arith.constant 0 : index
    %c0_17 = arith.constant 0 : index
    %33 = vector.load %arg2[%c0_15, %c0_16, %c0_17] : memref<1x8x8xi32, #tpu.memory_space<vmem>>, vector<1x8x8xi32>
    %34 = vector.shape_cast %33 : vector<1x8x8xi32> to vector<8x8xi32>
    %35 = vector.extract_strided_slice %30 {offsets = [0, 0], sizes = [8, 8], strides = [1, 1]} : vector<8x32xf32> to vector<8x8xf32>
    %36 = vector.extract_strided_slice %31 {offsets = [0, 0], sizes = [8, 8], strides = [1, 1]} : vector<8x32xf32> to vector<8x8xf32>
    %37 = vector.extract_strided_slice %32 {offsets = [0, 0], sizes = [8, 8], strides = [1, 1]} : vector<8x32xf32> to vector<8x8xf32>
    %38 = arith.truncf %35 : vector<8x8xf32> to vector<8x8xbf16>
    %39 = arith.truncf %36 : vector<8x8xf32> to vector<8x8xbf16>
    %cst_18 = arith.constant dense<0.000000e+00> : vector<8x8xf32>
    %40 = tpu.matmul %38, %39, %cst_18 {dimension_numbers = #tpu.dot_dimension_numbers<[1], [1], [0], [0], [0, 0, 1, 0], [], []>} : vector<8x8xbf16>, vector<8x8xbf16>, vector<8x8xf32> -> vector<8x8xf32>
    %cst_19 = arith.constant 0.353553385 : f32
    %41 = vector.broadcast %cst_19 : f32 to vector<8x8xf32>
    %42 = arith.mulf %40, %41 : vector<8x8xf32>
    %c0_i32 = arith.constant 0 : i32
    %43 = vector.broadcast %c0_i32 : i32 to vector<8x8xi32>
    %44 = arith.cmpi eq, %34, %43 : vector<8x8xi32>
    %cst_20 = arith.constant -1.000000e+09 : f32
    %45 = vector.broadcast %cst_20 : f32 to vector<8x8xf32>
    %46 = arith.select %44, %45, %42 : vector<8x8xi1>, vector<8x8xf32>
    %cst_21 = arith.constant dense<0xFF800000> : vector<8xf32>
    %47 = vector.multi_reduction <maximumf>, %46, %cst_21 [1] : vector<8x8xf32> to vector<8xf32>
    %48 = vector.shape_cast %47 : vector<8xf32> to vector<8x1xf32>
    %49 = vector.broadcast %48 : vector<8x1xf32> to vector<8x8xf32>
    %50 = arith.subf %46, %49 : vector<8x8xf32>
    %51 = math.exp %50 : vector<8x8xf32>
    %cst_22 = arith.constant dense<0.000000e+00> : vector<8xf32>
    %52 = vector.multi_reduction <add>, %51, %cst_22 [1] : vector<8x8xf32> to vector<8xf32>
    %53 = vector.shape_cast %52 : vector<8xf32> to vector<8x1xf32>
    %54 = tpu.reciprocal %53 {approx = true} : vector<8x1xf32> -> vector<8x1xf32>
    %55 = vector.broadcast %54 : vector<8x1xf32> to vector<8x8xf32>
    %56 = arith.mulf %51, %55 : vector<8x8xf32>
    %57 = arith.truncf %56 : vector<8x8xf32> to vector<8x8xbf16>
    %58 = arith.truncf %37 : vector<8x8xf32> to vector<8x8xbf16>
    %cst_23 = arith.constant dense<0.000000e+00> : vector<8x8xf32>
    %59 = tpu.matmul %57, %58, %cst_23 {dimension_numbers = #tpu.dot_dimension_numbers<[1], [0], [0], [1], [0, 0, 1, 1], [], []>} : vector<8x8xbf16>, vector<8x8xbf16>, vector<8x8xf32> -> vector<8x8xf32>
    %60 = vector.extract_strided_slice %30 {offsets = [0, 8], sizes = [8, 8], strides = [1, 1]} : vector<8x32xf32> to vector<8x8xf32>
    %61 = vector.extract_strided_slice %31 {offsets = [0, 8], sizes = [8, 8], strides = [1, 1]} : vector<8x32xf32> to vector<8x8xf32>
    %62 = vector.extract_strided_slice %32 {offsets = [0, 8], sizes = [8, 8], strides = [1, 1]} : vector<8x32xf32> to vector<8x8xf32>
    %63 = arith.truncf %60 : vector<8x8xf32> to vector<8x8xbf16>
    %64 = arith.truncf %61 : vector<8x8xf32> to vector<8x8xbf16>
    %cst_24 = arith.constant dense<0.000000e+00> : vector<8x8xf32>
    %65 = tpu.matmul %63, %64, %cst_24 {dimension_numbers = #tpu.dot_dimension_numbers<[1], [1], [0], [0], [0, 0, 1, 0], [], []>} : vector<8x8xbf16>, vector<8x8xbf16>, vector<8x8xf32> -> vector<8x8xf32>
    %cst_25 = arith.constant 0.353553385 : f32
    %66 = vector.broadcast %cst_25 : f32 to vector<8x8xf32>
    %67 = arith.mulf %65, %66 : vector<8x8xf32>
    %c0_i32_26 = arith.constant 0 : i32
    %68 = vector.broadcast %c0_i32_26 : i32 to vector<8x8xi32>
    %69 = arith.cmpi eq, %34, %68 : vector<8x8xi32>
    %cst_27 = arith.constant -1.000000e+09 : f32
    %70 = vector.broadcast %cst_27 : f32 to vector<8x8xf32>
    %71 = arith.select %69, %70, %67 : vector<8x8xi1>, vector<8x8xf32>
    %cst_28 = arith.constant dense<0xFF800000> : vector<8xf32>
    %72 = vector.multi_reduction <maximumf>, %71, %cst_28 [1] : vector<8x8xf32> to vector<8xf32>
    %73 = vector.shape_cast %72 : vector<8xf32> to vector<8x1xf32>
    %74 = vector.broadcast %73 : vector<8x1xf32> to vector<8x8xf32>
    %75 = arith.subf %71, %74 : vector<8x8xf32>
    %76 = math.exp %75 : vector<8x8xf32>
    %cst_29 = arith.constant dense<0.000000e+00> : vector<8xf32>
    %77 = vector.multi_reduction <add>, %76, %cst_29 [1] : vector<8x8xf32> to vector<8xf32>
    %78 = vector.shape_cast %77 : vector<8xf32> to vector<8x1xf32>
    %79 = tpu.reciprocal %78 {approx = true} : vector<8x1xf32> -> vector<8x1xf32>
    %80 = vector.broadcast %79 : vector<8x1xf32> to vector<8x8xf32>
    %81 = arith.mulf %76, %80 : vector<8x8xf32>
    %82 = arith.truncf %81 : vector<8x8xf32> to vector<8x8xbf16>
    %83 = arith.truncf %62 : vector<8x8xf32> to vector<8x8xbf16>
    %cst_30 = arith.constant dense<0.000000e+00> : vector<8x8xf32>
    %84 = tpu.matmul %82, %83, %cst_30 {dimension_numbers = #tpu.dot_dimension_numbers<[1], [0], [0], [1], [0, 0, 1, 1], [], []>} : vector<8x8xbf16>, vector<8x8xbf16>, vector<8x8xf32> -> vector<8x8xf32>
    %85 = vector.extract_strided_slice %30 {offsets = [0, 16], sizes = [8, 8], strides = [1, 1]} : vector<8x32xf32> to vector<8x8xf32>
    %86 = vector.extract_strided_slice %31 {offsets = [0, 16], sizes = [8, 8], strides = [1, 1]} : vector<8x32xf32> to vector<8x8xf32>
    %87 = vector.extract_strided_slice %32 {offsets = [0, 16], sizes = [8, 8], strides = [1, 1]} : vector<8x32xf32> to vector<8x8xf32>
    %88 = arith.truncf %85 : vector<8x8xf32> to vector<8x8xbf16>
    %89 = arith.truncf %86 : vector<8x8xf32> to vector<8x8xbf16>
    %cst_31 = arith.constant dense<0.000000e+00> : vector<8x8xf32>
    %90 = tpu.matmul %88, %89, %cst_31 {dimension_numbers = #tpu.dot_dimension_numbers<[1], [1], [0], [0], [0, 0, 1, 0], [], []>} : vector<8x8xbf16>, vector<8x8xbf16>, vector<8x8xf32> -> vector<8x8xf32>
    %cst_32 = arith.constant 0.353553385 : f32
    %91 = vector.broadcast %cst_32 : f32 to vector<8x8xf32>
    %92 = arith.mulf %90, %91 : vector<8x8xf32>
    %c0_i32_33 = arith.constant 0 : i32
    %93 = vector.broadcast %c0_i32_33 : i32 to vector<8x8xi32>
    %94 = arith.cmpi eq, %34, %93 : vector<8x8xi32>
    %cst_34 = arith.constant -1.000000e+09 : f32
    %95 = vector.broadcast %cst_34 : f32 to vector<8x8xf32>
    %96 = arith.select %94, %95, %92 : vector<8x8xi1>, vector<8x8xf32>
    %cst_35 = arith.constant dense<0xFF800000> : vector<8xf32>
    %97 = vector.multi_reduction <maximumf>, %96, %cst_35 [1] : vector<8x8xf32> to vector<8xf32>
    %98 = vector.shape_cast %97 : vector<8xf32> to vector<8x1xf32>
    %99 = vector.broadcast %98 : vector<8x1xf32> to vector<8x8xf32>
    %100 = arith.subf %96, %99 : vector<8x8xf32>
    %101 = math.exp %100 : vector<8x8xf32>
    %cst_36 = arith.constant dense<0.000000e+00> : vector<8xf32>
    %102 = vector.multi_reduction <add>, %101, %cst_36 [1] : vector<8x8xf32> to vector<8xf32>
    %103 = vector.shape_cast %102 : vector<8xf32> to vector<8x1xf32>
    %104 = tpu.reciprocal %103 {approx = true} : vector<8x1xf32> -> vector<8x1xf32>
    %105 = vector.broadcast %104 : vector<8x1xf32> to vector<8x8xf32>
    %106 = arith.mulf %101, %105 : vector<8x8xf32>
    %107 = arith.truncf %106 : vector<8x8xf32> to vector<8x8xbf16>
    %108 = arith.truncf %87 : vector<8x8xf32> to vector<8x8xbf16>
    %cst_37 = arith.constant dense<0.000000e+00> : vector<8x8xf32>
    %109 = tpu.matmul %107, %108, %cst_37 {dimension_numbers = #tpu.dot_dimension_numbers<[1], [0], [0], [1], [0, 0, 1, 1], [], []>} : vector<8x8xbf16>, vector<8x8xbf16>, vector<8x8xf32> -> vector<8x8xf32>
    %110 = vector.extract_strided_slice %30 {offsets = [0, 24], sizes = [8, 8], strides = [1, 1]} : vector<8x32xf32> to vector<8x8xf32>
    %111 = vector.extract_strided_slice %31 {offsets = [0, 24], sizes = [8, 8], strides = [1, 1]} : vector<8x32xf32> to vector<8x8xf32>
    %112 = vector.extract_strided_slice %32 {offsets = [0, 24], sizes = [8, 8], strides = [1, 1]} : vector<8x32xf32> to vector<8x8xf32>
    %113 = arith.truncf %110 : vector<8x8xf32> to vector<8x8xbf16>
    %114 = arith.truncf %111 : vector<8x8xf32> to vector<8x8xbf16>
    %cst_38 = arith.constant dense<0.000000e+00> : vector<8x8xf32>
    %115 = tpu.matmul %113, %114, %cst_38 {dimension_numbers = #tpu.dot_dimension_numbers<[1], [1], [0], [0], [0, 0, 1, 0], [], []>} : vector<8x8xbf16>, vector<8x8xbf16>, vector<8x8xf32> -> vector<8x8xf32>
    %cst_39 = arith.constant 0.353553385 : f32
    %116 = vector.broadcast %cst_39 : f32 to vector<8x8xf32>
    %117 = arith.mulf %115, %116 : vector<8x8xf32>
    %c0_i32_40 = arith.constant 0 : i32
    %118 = vector.broadcast %c0_i32_40 : i32 to vector<8x8xi32>
    %119 = arith.cmpi eq, %34, %118 : vector<8x8xi32>
    %cst_41 = arith.constant -1.000000e+09 : f32
    %120 = vector.broadcast %cst_41 : f32 to vector<8x8xf32>
    %121 = arith.select %119, %120, %117 : vector<8x8xi1>, vector<8x8xf32>
    %cst_42 = arith.constant dense<0xFF800000> : vector<8xf32>
    %122 = vector.multi_reduction <maximumf>, %121, %cst_42 [1] : vector<8x8xf32> to vector<8xf32>
    %123 = vector.shape_cast %122 : vector<8xf32> to vector<8x1xf32>
    %124 = vector.broadcast %123 : vector<8x1xf32> to vector<8x8xf32>
    %125 = arith.subf %121, %124 : vector<8x8xf32>
    %126 = math.exp %125 : vector<8x8xf32>
    %cst_43 = arith.constant dense<0.000000e+00> : vector<8xf32>
    %127 = vector.multi_reduction <add>, %126, %cst_43 [1] : vector<8x8xf32> to vector<8xf32>
    %128 = vector.shape_cast %127 : vector<8xf32> to vector<8x1xf32>
    %129 = tpu.reciprocal %128 {approx = true} : vector<8x1xf32> -> vector<8x1xf32>
    %130 = vector.broadcast %129 : vector<8x1xf32> to vector<8x8xf32>
    %131 = arith.mulf %126, %130 : vector<8x8xf32>
    %132 = arith.truncf %131 : vector<8x8xf32> to vector<8x8xbf16>
    %133 = arith.truncf %112 : vector<8x8xf32> to vector<8x8xbf16>
    %cst_44 = arith.constant dense<0.000000e+00> : vector<8x8xf32>
    %134 = tpu.matmul %132, %133, %cst_44 {dimension_numbers = #tpu.dot_dimension_numbers<[1], [0], [0], [1], [0, 0, 1, 1], [], []>} : vector<8x8xbf16>, vector<8x8xbf16>, vector<8x8xf32> -> vector<8x8xf32>
    %135 = tpu.concatenate %59, %84, %109, %134 in 1 : vector<8x8xf32>, vector<8x8xf32>, vector<8x8xf32>, vector<8x8xf32> -> vector<8x32xf32>
    %136 = arith.truncf %135 : vector<8x32xf32> to vector<8x32xbf16>
    %c0_45 = arith.constant 0 : index
    %c0_46 = arith.constant 0 : index
    %137 = vector.load %arg7[%c0_45, %c0_46] : memref<32x32xbf16, #tpu.memory_space<vmem>>, vector<32x32xbf16>
    %cst_47 = arith.constant dense<0.000000e+00> : vector<8x32xf32>
    %138 = tpu.matmul %136, %137, %cst_47 {dimension_numbers = #tpu.dot_dimension_numbers<[1], [0], [0], [1], [0, 0, 1, 1], [], []>} : vector<8x32xbf16>, vector<32x32xbf16>, vector<8x32xf32> -> vector<8x32xf32>
    %c0_48 = arith.constant 0 : index
    %c0_49 = arith.constant 0 : index
    %139 = vector.load %arg8[%c0_48, %c0_49] : memref<1x32xf32, #tpu.memory_space<vmem>>, vector<1x32xf32>
    %140 = vector.broadcast %139 : vector<1x32xf32> to vector<8x32xf32>
    %141 = arith.addf %138, %140 : vector<8x32xf32>
    %142 = arith.addf %1, %141 : vector<8x32xf32>
    %c0_50 = arith.constant 0 : index
    %c0_51 = arith.constant 0 : index
    %c0_52 = arith.constant 0 : index
    %143 = vector.load %arg9[%c0_50, %c0_51, %c0_52] : memref<1x8x32xf32, #tpu.memory_space<vmem>>, vector<1x8x32xf32>
    %144 = vector.shape_cast %143 : vector<1x8x32xf32> to vector<8x32xf32>
    %145 = vector.shape_cast %142 : vector<8x32xf32> to vector<1x8x32xf32>
    tpu.vector_store %arg9[%c0_50, %c0_51, %c0_52], %145 {strides = array<i32>} : memref<1x8x32xf32, #tpu.memory_space<vmem>>, vector<1x8x32xf32>,
    return
  }
  func.func @transform_0(%arg0: i32) -> (i32, i32, i32) {
    %c0_i32 = arith.constant 0 : i32
    %c0_i32_0 = arith.constant 0 : i32
    %c0_i32_1 = arith.constant 0 : i32
    return %arg0, %c0_i32, %c0_i32_0 : i32, i32, i32
  }
  func.func @transform_1(%arg0: i32) -> (i32, i32, i32) {
    %c0_i32 = arith.constant 0 : i32
    %c0_i32_0 = arith.constant 0 : i32
    %c0_i32_1 = arith.constant 0 : i32
    return %arg0, %c0_i32, %c0_i32_0 : i32, i32, i32
  }
  func.func @transform_2(%arg0: i32) -> (i32, i32) {
    %c0_i32 = arith.constant 0 : i32
    %c0_i32_0 = arith.constant 0 : i32
    %c0_i32_1 = arith.constant 0 : i32
    return %c0_i32, %c0_i32_0 : i32, i32
  }
  func.func @transform_3(%arg0: i32) -> (i32, i32) {
    %c0_i32 = arith.constant 0 : i32
    %c0_i32_0 = arith.constant 0 : i32
    %c0_i32_1 = arith.constant 0 : i32
    return %c0_i32, %c0_i32_0 : i32, i32
  }
  func.func @transform_4(%arg0: i32) -> (i32, i32) {
    %c0_i32 = arith.constant 0 : i32
    %c0_i32_0 = arith.constant 0 : i32
    %c0_i32_1 = arith.constant 0 : i32
    return %c0_i32, %c0_i32_0 : i32, i32
  }
  func.func @transform_5(%arg0: i32) -> (i32, i32) {
    %c0_i32 = arith.constant 0 : i32
    %c0_i32_0 = arith.constant 0 : i32
    %c0_i32_1 = arith.constant 0 : i32
    return %c0_i32, %c0_i32_0 : i32, i32
  }
  func.func @transform_6(%arg0: i32) -> (i32, i32) {
    %c0_i32 = arith.constant 0 : i32
    %c0_i32_0 = arith.constant 0 : i32
    %c0_i32_1 = arith.constant 0 : i32
    return %c0_i32, %c0_i32_0 : i32, i32
  }
  func.func @transform_7(%arg0: i32) -> (i32, i32) {
    %c0_i32 = arith.constant 0 : i32
    %c0_i32_0 = arith.constant 0 : i32
    %c0_i32_1 = arith.constant 0 : i32
    return %c0_i32, %c0_i32_0 : i32, i32
  }
  func.func @transform_8(%arg0: i32) -> (i32, i32, i32) {
    %c0_i32 = arith.constant 0 : i32
    %c0_i32_0 = arith.constant 0 : i32
    %c0_i32_1 = arith.constant 0 : i32
    return %arg0, %c0_i32, %c0_i32_0 : i32, i32, i32
  }
}

module attributes {stable_mosaic.version = 11 : i64} {
  func.func @_cross_attn_sublayer_kernel(%arg0: i32, %arg1: memref<1x8x32xf32, #tpu.memory_space<vmem>>, %arg2: memref<1x8x32xf32, #tpu.memory_space<vmem>>, %arg3: memref<1x1x8xi32, #tpu.memory_space<vmem>>, %arg4: memref<1x32xf32, #tpu.memory_space<vmem>>, %arg5: memref<1x32xf32, #tpu.memory_space<vmem>>, %arg6: memref<32x32xbf16, #tpu.memory_space<vmem>>, %arg7: memref<1x32xf32, #tpu.memory_space<vmem>>, %arg8: memref<32x64xbf16, #tpu.memory_space<vmem>>, %arg9: memref<1x64xf32, #tpu.memory_space<vmem>>, %arg10: memref<32x32xbf16, #tpu.memory_space<vmem>>, %arg11: memref<1x32xf32, #tpu.memory_space<vmem>>, %arg12: memref<1x8x32xf32, #tpu.memory_space<vmem>>) attributes {dimension_semantics = [#tpu.dimension_semantics<parallel>], iteration_bounds = array<i64: 2>, scalar_prefetch = 0 : i64, scratch_operands = 0 : i64, tpu.core_type = #tpu.core_type<tc>, window_params = [{transform_indices = @transform_0, window_bounds = array<i64: 1, 8, 32>}, {transform_indices = @transform_1, window_bounds = array<i64: 1, 8, 32>}, {transform_indices = @transform_2, window_bounds = array<i64: 1, 1, 8>}, {pipeline_mode = #tpu.pipeline_mode<synchronous>, transform_indices = @transform_3, window_bounds = array<i64: 1, 32>}, {pipeline_mode = #tpu.pipeline_mode<synchronous>, transform_indices = @transform_4, window_bounds = array<i64: 1, 32>}, {pipeline_mode = #tpu.pipeline_mode<synchronous>, transform_indices = @transform_5, window_bounds = array<i64: 32, 32>}, {pipeline_mode = #tpu.pipeline_mode<synchronous>, transform_indices = @transform_6, window_bounds = array<i64: 1, 32>}, {pipeline_mode = #tpu.pipeline_mode<synchronous>, transform_indices = @transform_7, window_bounds = array<i64: 32, 64>}, {pipeline_mode = #tpu.pipeline_mode<synchronous>, transform_indices = @transform_8, window_bounds = array<i64: 1, 64>}, {pipeline_mode = #tpu.pipeline_mode<synchronous>, transform_indices = @transform_9, window_bounds = array<i64: 32, 32>}, {pipeline_mode = #tpu.pipeline_mode<synchronous>, transform_indices = @transform_10, window_bounds = array<i64: 1, 32>}, {transform_indices = @transform_11, window_bounds = array<i64: 1, 8, 32>}]} {
    %c0 = arith.constant 0 : index
    %c0_0 = arith.constant 0 : index
    %c0_1 = arith.constant 0 : index
    %0 = vector.load %arg1[%c0, %c0_0, %c0_1] : memref<1x8x32xf32, #tpu.memory_space<vmem>>, vector<1x8x32xf32>
    %1 = vector.shape_cast %0 : vector<1x8x32xf32> to vector<8x32xf32>
    %c0_2 = arith.constant 0 : index
    %c0_3 = arith.constant 0 : index
    %c0_4 = arith.constant 0 : index
    %2 = vector.load %arg2[%c0_2, %c0_3, %c0_4] : memref<1x8x32xf32, #tpu.memory_space<vmem>>, vector<1x8x32xf32>
    %3 = vector.shape_cast %2 : vector<1x8x32xf32> to vector<8x32xf32>
    %c0_5 = arith.constant 0 : index
    %c0_6 = arith.constant 0 : index
    %4 = vector.load %arg4[%c0_5, %c0_6] : memref<1x32xf32, #tpu.memory_space<vmem>>, vector<1x32xf32>
    %c0_7 = arith.constant 0 : index
    %c0_8 = arith.constant 0 : index
    %5 = vector.load %arg5[%c0_7, %c0_8] : memref<1x32xf32, #tpu.memory_space<vmem>>, vector<1x32xf32>
    %cst = arith.constant dense<0.000000e+00> : vector<8xf32>
    %6 = vector.multi_reduction <add>, %1, %cst [1] : vector<8x32xf32> to vector<8xf32>
    %7 = vector.shape_cast %6 : vector<8xf32> to vector<8x1xf32>
    %cst_9 = arith.constant 3.200000e+01 : f32
    %8 = vector.broadcast %cst_9 : f32 to vector<8x1xf32>
    %9 = arith.divf %7, %8 : vector<8x1xf32>
    %10 = vector.broadcast %9 : vector<8x1xf32> to vector<8x32xf32>
    %11 = arith.subf %1, %10 : vector<8x32xf32>
    %12 = arith.mulf %11, %11 : vector<8x32xf32>
    %cst_10 = arith.constant dense<0.000000e+00> : vector<8xf32>
    %13 = vector.multi_reduction <add>, %12, %cst_10 [1] : vector<8x32xf32> to vector<8xf32>
    %14 = vector.shape_cast %13 : vector<8xf32> to vector<8x1xf32>
    %cst_11 = arith.constant 0.0322580636 : f32
    %15 = vector.broadcast %cst_11 : f32 to vector<8x1xf32>
    %16 = arith.mulf %14, %15 : vector<8x1xf32>
    %cst_12 = arith.constant 9.99999997E-7 : f32
    %17 = vector.broadcast %cst_12 : f32 to vector<8x1xf32>
    %18 = arith.addf %16, %17 : vector<8x1xf32>
    %19 = math.rsqrt %18 : vector<8x1xf32>
    %20 = vector.broadcast %19 : vector<8x1xf32> to vector<8x32xf32>
    %21 = arith.mulf %11, %20 : vector<8x32xf32>
    %22 = vector.broadcast %4 : vector<1x32xf32> to vector<8x32xf32>
    %23 = arith.mulf %22, %21 : vector<8x32xf32>
    %24 = vector.broadcast %5 : vector<1x32xf32> to vector<8x32xf32>
    %25 = arith.addf %23, %24 : vector<8x32xf32>
    %26 = arith.truncf %25 : vector<8x32xf32> to vector<8x32xbf16>
    %c0_13 = arith.constant 0 : index
    %c0_14 = arith.constant 0 : index
    %27 = vector.load %arg6[%c0_13, %c0_14] : memref<32x32xbf16, #tpu.memory_space<vmem>>, vector<32x32xbf16>
    %cst_15 = arith.constant dense<0.000000e+00> : vector<8x32xf32>
    %28 = tpu.matmul %26, %27, %cst_15 {dimension_numbers = #tpu.dot_dimension_numbers<[1], [0], [0], [1], [0, 0, 1, 1], [], []>} : vector<8x32xbf16>, vector<32x32xbf16>, vector<8x32xf32> -> vector<8x32xf32>
    %c0_16 = arith.constant 0 : index
    %c0_17 = arith.constant 0 : index
    %29 = vector.load %arg7[%c0_16, %c0_17] : memref<1x32xf32, #tpu.memory_space<vmem>>, vector<1x32xf32>
    %30 = vector.broadcast %29 : vector<1x32xf32> to vector<8x32xf32>
    %31 = arith.addf %28, %30 : vector<8x32xf32>
    %32 = arith.truncf %3 : vector<8x32xf32> to vector<8x32xbf16>
    %c0_18 = arith.constant 0 : index
    %c0_19 = arith.constant 0 : index
    %33 = vector.load %arg8[%c0_18, %c0_19] : memref<32x64xbf16, #tpu.memory_space<vmem>>, vector<32x64xbf16>
    %cst_20 = arith.constant dense<0.000000e+00> : vector<8x64xf32>
    %34 = tpu.matmul %32, %33, %cst_20 {dimension_numbers = #tpu.dot_dimension_numbers<[1], [0], [0], [1], [0, 0, 1, 1], [], []>} : vector<8x32xbf16>, vector<32x64xbf16>, vector<8x64xf32> -> vector<8x64xf32>
    %c0_21 = arith.constant 0 : index
    %c0_22 = arith.constant 0 : index
    %35 = vector.load %arg9[%c0_21, %c0_22] : memref<1x64xf32, #tpu.memory_space<vmem>>, vector<1x64xf32>
    %36 = vector.broadcast %35 : vector<1x64xf32> to vector<8x64xf32>
    %37 = arith.addf %34, %36 : vector<8x64xf32>
    %38 = vector.extract_strided_slice %37 {offsets = [0, 0], sizes = [8, 32], strides = [1, 1]} : vector<8x64xf32> to vector<8x32xf32>
    %39 = vector.extract_strided_slice %37 {offsets = [0, 32], sizes = [8, 32], strides = [1, 1]} : vector<8x64xf32> to vector<8x32xf32>
    %c0_23 = arith.constant 0 : index
    %c0_24 = arith.constant 0 : index
    %c0_25 = arith.constant 0 : index
    %40 = vector.load %arg3[%c0_23, %c0_24, %c0_25] : memref<1x1x8xi32, #tpu.memory_space<vmem>>, vector<1x1x8xi32>
    %41 = vector.shape_cast %40 : vector<1x1x8xi32> to vector<1x8xi32>
    %42 = vector.extract_strided_slice %31 {offsets = [0, 0], sizes = [8, 8], strides = [1, 1]} : vector<8x32xf32> to vector<8x8xf32>
    %43 = vector.extract_strided_slice %38 {offsets = [0, 0], sizes = [8, 8], strides = [1, 1]} : vector<8x32xf32> to vector<8x8xf32>
    %44 = vector.extract_strided_slice %39 {offsets = [0, 0], sizes = [8, 8], strides = [1, 1]} : vector<8x32xf32> to vector<8x8xf32>
    %45 = arith.truncf %42 : vector<8x8xf32> to vector<8x8xbf16>
    %46 = arith.truncf %43 : vector<8x8xf32> to vector<8x8xbf16>
    %cst_26 = arith.constant dense<0.000000e+00> : vector<8x8xf32>
    %47 = tpu.matmul %45, %46, %cst_26 {dimension_numbers = #tpu.dot_dimension_numbers<[1], [1], [0], [0], [0, 0, 1, 0], [], []>} : vector<8x8xbf16>, vector<8x8xbf16>, vector<8x8xf32> -> vector<8x8xf32>
    %cst_27 = arith.constant 0.353553385 : f32
    %48 = vector.broadcast %cst_27 : f32 to vector<8x8xf32>
    %49 = arith.mulf %47, %48 : vector<8x8xf32>
    %c0_i32 = arith.constant 0 : i32
    %50 = vector.broadcast %c0_i32 : i32 to vector<1x8xi32>
    %51 = arith.cmpi eq, %41, %50 : vector<1x8xi32>
    %cst_28 = arith.constant -1.000000e+09 : f32
    %52 = vector.shape_cast %51 : vector<1x8xi1> to vector<1x8xi1>
    %53 = vector.broadcast %52 : vector<1x8xi1> to vector<8x8xi1>
    %54 = vector.broadcast %cst_28 : f32 to vector<8x8xf32>
    %55 = arith.select %53, %54, %49 : vector<8x8xi1>, vector<8x8xf32>
    %cst_29 = arith.constant dense<0xFF800000> : vector<8xf32>
    %56 = vector.multi_reduction <maximumf>, %55, %cst_29 [1] : vector<8x8xf32> to vector<8xf32>
    %57 = vector.shape_cast %56 : vector<8xf32> to vector<8x1xf32>
    %58 = vector.broadcast %57 : vector<8x1xf32> to vector<8x8xf32>
    %59 = arith.subf %55, %58 : vector<8x8xf32>
    %60 = math.exp %59 : vector<8x8xf32>
    %cst_30 = arith.constant dense<0.000000e+00> : vector<8xf32>
    %61 = vector.multi_reduction <add>, %60, %cst_30 [1] : vector<8x8xf32> to vector<8xf32>
    %62 = vector.shape_cast %61 : vector<8xf32> to vector<8x1xf32>
    %63 = tpu.reciprocal %62 {approx = true} : vector<8x1xf32> -> vector<8x1xf32>
    %64 = vector.broadcast %63 : vector<8x1xf32> to vector<8x8xf32>
    %65 = arith.mulf %60, %64 : vector<8x8xf32>
    %66 = arith.truncf %65 : vector<8x8xf32> to vector<8x8xbf16>
    %67 = arith.truncf %44 : vector<8x8xf32> to vector<8x8xbf16>
    %cst_31 = arith.constant dense<0.000000e+00> : vector<8x8xf32>
    %68 = tpu.matmul %66, %67, %cst_31 {dimension_numbers = #tpu.dot_dimension_numbers<[1], [0], [0], [1], [0, 0, 1, 1], [], []>} : vector<8x8xbf16>, vector<8x8xbf16>, vector<8x8xf32> -> vector<8x8xf32>
    %69 = vector.extract_strided_slice %31 {offsets = [0, 8], sizes = [8, 8], strides = [1, 1]} : vector<8x32xf32> to vector<8x8xf32>
    %70 = vector.extract_strided_slice %38 {offsets = [0, 8], sizes = [8, 8], strides = [1, 1]} : vector<8x32xf32> to vector<8x8xf32>
    %71 = vector.extract_strided_slice %39 {offsets = [0, 8], sizes = [8, 8], strides = [1, 1]} : vector<8x32xf32> to vector<8x8xf32>
    %72 = arith.truncf %69 : vector<8x8xf32> to vector<8x8xbf16>
    %73 = arith.truncf %70 : vector<8x8xf32> to vector<8x8xbf16>
    %cst_32 = arith.constant dense<0.000000e+00> : vector<8x8xf32>
    %74 = tpu.matmul %72, %73, %cst_32 {dimension_numbers = #tpu.dot_dimension_numbers<[1], [1], [0], [0], [0, 0, 1, 0], [], []>} : vector<8x8xbf16>, vector<8x8xbf16>, vector<8x8xf32> -> vector<8x8xf32>
    %cst_33 = arith.constant 0.353553385 : f32
    %75 = vector.broadcast %cst_33 : f32 to vector<8x8xf32>
    %76 = arith.mulf %74, %75 : vector<8x8xf32>
    %c0_i32_34 = arith.constant 0 : i32
    %77 = vector.broadcast %c0_i32_34 : i32 to vector<1x8xi32>
    %78 = arith.cmpi eq, %41, %77 : vector<1x8xi32>
    %cst_35 = arith.constant -1.000000e+09 : f32
    %79 = vector.shape_cast %78 : vector<1x8xi1> to vector<1x8xi1>
    %80 = vector.broadcast %79 : vector<1x8xi1> to vector<8x8xi1>
    %81 = vector.broadcast %cst_35 : f32 to vector<8x8xf32>
    %82 = arith.select %80, %81, %76 : vector<8x8xi1>, vector<8x8xf32>
    %cst_36 = arith.constant dense<0xFF800000> : vector<8xf32>
    %83 = vector.multi_reduction <maximumf>, %82, %cst_36 [1] : vector<8x8xf32> to vector<8xf32>
    %84 = vector.shape_cast %83 : vector<8xf32> to vector<8x1xf32>
    %85 = vector.broadcast %84 : vector<8x1xf32> to vector<8x8xf32>
    %86 = arith.subf %82, %85 : vector<8x8xf32>
    %87 = math.exp %86 : vector<8x8xf32>
    %cst_37 = arith.constant dense<0.000000e+00> : vector<8xf32>
    %88 = vector.multi_reduction <add>, %87, %cst_37 [1] : vector<8x8xf32> to vector<8xf32>
    %89 = vector.shape_cast %88 : vector<8xf32> to vector<8x1xf32>
    %90 = tpu.reciprocal %89 {approx = true} : vector<8x1xf32> -> vector<8x1xf32>
    %91 = vector.broadcast %90 : vector<8x1xf32> to vector<8x8xf32>
    %92 = arith.mulf %87, %91 : vector<8x8xf32>
    %93 = arith.truncf %92 : vector<8x8xf32> to vector<8x8xbf16>
    %94 = arith.truncf %71 : vector<8x8xf32> to vector<8x8xbf16>
    %cst_38 = arith.constant dense<0.000000e+00> : vector<8x8xf32>
    %95 = tpu.matmul %93, %94, %cst_38 {dimension_numbers = #tpu.dot_dimension_numbers<[1], [0], [0], [1], [0, 0, 1, 1], [], []>} : vector<8x8xbf16>, vector<8x8xbf16>, vector<8x8xf32> -> vector<8x8xf32>
    %96 = vector.extract_strided_slice %31 {offsets = [0, 16], sizes = [8, 8], strides = [1, 1]} : vector<8x32xf32> to vector<8x8xf32>
    %97 = vector.extract_strided_slice %38 {offsets = [0, 16], sizes = [8, 8], strides = [1, 1]} : vector<8x32xf32> to vector<8x8xf32>
    %98 = vector.extract_strided_slice %39 {offsets = [0, 16], sizes = [8, 8], strides = [1, 1]} : vector<8x32xf32> to vector<8x8xf32>
    %99 = arith.truncf %96 : vector<8x8xf32> to vector<8x8xbf16>
    %100 = arith.truncf %97 : vector<8x8xf32> to vector<8x8xbf16>
    %cst_39 = arith.constant dense<0.000000e+00> : vector<8x8xf32>
    %101 = tpu.matmul %99, %100, %cst_39 {dimension_numbers = #tpu.dot_dimension_numbers<[1], [1], [0], [0], [0, 0, 1, 0], [], []>} : vector<8x8xbf16>, vector<8x8xbf16>, vector<8x8xf32> -> vector<8x8xf32>
    %cst_40 = arith.constant 0.353553385 : f32
    %102 = vector.broadcast %cst_40 : f32 to vector<8x8xf32>
    %103 = arith.mulf %101, %102 : vector<8x8xf32>
    %c0_i32_41 = arith.constant 0 : i32
    %104 = vector.broadcast %c0_i32_41 : i32 to vector<1x8xi32>
    %105 = arith.cmpi eq, %41, %104 : vector<1x8xi32>
    %cst_42 = arith.constant -1.000000e+09 : f32
    %106 = vector.shape_cast %105 : vector<1x8xi1> to vector<1x8xi1>
    %107 = vector.broadcast %106 : vector<1x8xi1> to vector<8x8xi1>
    %108 = vector.broadcast %cst_42 : f32 to vector<8x8xf32>
    %109 = arith.select %107, %108, %103 : vector<8x8xi1>, vector<8x8xf32>
    %cst_43 = arith.constant dense<0xFF800000> : vector<8xf32>
    %110 = vector.multi_reduction <maximumf>, %109, %cst_43 [1] : vector<8x8xf32> to vector<8xf32>
    %111 = vector.shape_cast %110 : vector<8xf32> to vector<8x1xf32>
    %112 = vector.broadcast %111 : vector<8x1xf32> to vector<8x8xf32>
    %113 = arith.subf %109, %112 : vector<8x8xf32>
    %114 = math.exp %113 : vector<8x8xf32>
    %cst_44 = arith.constant dense<0.000000e+00> : vector<8xf32>
    %115 = vector.multi_reduction <add>, %114, %cst_44 [1] : vector<8x8xf32> to vector<8xf32>
    %116 = vector.shape_cast %115 : vector<8xf32> to vector<8x1xf32>
    %117 = tpu.reciprocal %116 {approx = true} : vector<8x1xf32> -> vector<8x1xf32>
    %118 = vector.broadcast %117 : vector<8x1xf32> to vector<8x8xf32>
    %119 = arith.mulf %114, %118 : vector<8x8xf32>
    %120 = arith.truncf %119 : vector<8x8xf32> to vector<8x8xbf16>
    %121 = arith.truncf %98 : vector<8x8xf32> to vector<8x8xbf16>
    %cst_45 = arith.constant dense<0.000000e+00> : vector<8x8xf32>
    %122 = tpu.matmul %120, %121, %cst_45 {dimension_numbers = #tpu.dot_dimension_numbers<[1], [0], [0], [1], [0, 0, 1, 1], [], []>} : vector<8x8xbf16>, vector<8x8xbf16>, vector<8x8xf32> -> vector<8x8xf32>
    %123 = vector.extract_strided_slice %31 {offsets = [0, 24], sizes = [8, 8], strides = [1, 1]} : vector<8x32xf32> to vector<8x8xf32>
    %124 = vector.extract_strided_slice %38 {offsets = [0, 24], sizes = [8, 8], strides = [1, 1]} : vector<8x32xf32> to vector<8x8xf32>
    %125 = vector.extract_strided_slice %39 {offsets = [0, 24], sizes = [8, 8], strides = [1, 1]} : vector<8x32xf32> to vector<8x8xf32>
    %126 = arith.truncf %123 : vector<8x8xf32> to vector<8x8xbf16>
    %127 = arith.truncf %124 : vector<8x8xf32> to vector<8x8xbf16>
    %cst_46 = arith.constant dense<0.000000e+00> : vector<8x8xf32>
    %128 = tpu.matmul %126, %127, %cst_46 {dimension_numbers = #tpu.dot_dimension_numbers<[1], [1], [0], [0], [0, 0, 1, 0], [], []>} : vector<8x8xbf16>, vector<8x8xbf16>, vector<8x8xf32> -> vector<8x8xf32>
    %cst_47 = arith.constant 0.353553385 : f32
    %129 = vector.broadcast %cst_47 : f32 to vector<8x8xf32>
    %130 = arith.mulf %128, %129 : vector<8x8xf32>
    %c0_i32_48 = arith.constant 0 : i32
    %131 = vector.broadcast %c0_i32_48 : i32 to vector<1x8xi32>
    %132 = arith.cmpi eq, %41, %131 : vector<1x8xi32>
    %cst_49 = arith.constant -1.000000e+09 : f32
    %133 = vector.shape_cast %132 : vector<1x8xi1> to vector<1x8xi1>
    %134 = vector.broadcast %133 : vector<1x8xi1> to vector<8x8xi1>
    %135 = vector.broadcast %cst_49 : f32 to vector<8x8xf32>
    %136 = arith.select %134, %135, %130 : vector<8x8xi1>, vector<8x8xf32>
    %cst_50 = arith.constant dense<0xFF800000> : vector<8xf32>
    %137 = vector.multi_reduction <maximumf>, %136, %cst_50 [1] : vector<8x8xf32> to vector<8xf32>
    %138 = vector.shape_cast %137 : vector<8xf32> to vector<8x1xf32>
    %139 = vector.broadcast %138 : vector<8x1xf32> to vector<8x8xf32>
    %140 = arith.subf %136, %139 : vector<8x8xf32>
    %141 = math.exp %140 : vector<8x8xf32>
    %cst_51 = arith.constant dense<0.000000e+00> : vector<8xf32>
    %142 = vector.multi_reduction <add>, %141, %cst_51 [1] : vector<8x8xf32> to vector<8xf32>
    %143 = vector.shape_cast %142 : vector<8xf32> to vector<8x1xf32>
    %144 = tpu.reciprocal %143 {approx = true} : vector<8x1xf32> -> vector<8x1xf32>
    %145 = vector.broadcast %144 : vector<8x1xf32> to vector<8x8xf32>
    %146 = arith.mulf %141, %145 : vector<8x8xf32>
    %147 = arith.truncf %146 : vector<8x8xf32> to vector<8x8xbf16>
    %148 = arith.truncf %125 : vector<8x8xf32> to vector<8x8xbf16>
    %cst_52 = arith.constant dense<0.000000e+00> : vector<8x8xf32>
    %149 = tpu.matmul %147, %148, %cst_52 {dimension_numbers = #tpu.dot_dimension_numbers<[1], [0], [0], [1], [0, 0, 1, 1], [], []>} : vector<8x8xbf16>, vector<8x8xbf16>, vector<8x8xf32> -> vector<8x8xf32>
    %150 = tpu.concatenate %68, %95, %122, %149 in 1 : vector<8x8xf32>, vector<8x8xf32>, vector<8x8xf32>, vector<8x8xf32> -> vector<8x32xf32>
    %151 = arith.truncf %150 : vector<8x32xf32> to vector<8x32xbf16>
    %c0_53 = arith.constant 0 : index
    %c0_54 = arith.constant 0 : index
    %152 = vector.load %arg10[%c0_53, %c0_54] : memref<32x32xbf16, #tpu.memory_space<vmem>>, vector<32x32xbf16>
    %cst_55 = arith.constant dense<0.000000e+00> : vector<8x32xf32>
    %153 = tpu.matmul %151, %152, %cst_55 {dimension_numbers = #tpu.dot_dimension_numbers<[1], [0], [0], [1], [0, 0, 1, 1], [], []>} : vector<8x32xbf16>, vector<32x32xbf16>, vector<8x32xf32> -> vector<8x32xf32>
    %c0_56 = arith.constant 0 : index
    %c0_57 = arith.constant 0 : index
    %154 = vector.load %arg11[%c0_56, %c0_57] : memref<1x32xf32, #tpu.memory_space<vmem>>, vector<1x32xf32>
    %155 = vector.broadcast %154 : vector<1x32xf32> to vector<8x32xf32>
    %156 = arith.addf %153, %155 : vector<8x32xf32>
    %157 = arith.addf %1, %156 : vector<8x32xf32>
    %c0_58 = arith.constant 0 : index
    %c0_59 = arith.constant 0 : index
    %c0_60 = arith.constant 0 : index
    %158 = vector.load %arg12[%c0_58, %c0_59, %c0_60] : memref<1x8x32xf32, #tpu.memory_space<vmem>>, vector<1x8x32xf32>
    %159 = vector.shape_cast %158 : vector<1x8x32xf32> to vector<8x32xf32>
    %160 = vector.shape_cast %157 : vector<8x32xf32> to vector<1x8x32xf32>
    tpu.vector_store %arg12[%c0_58, %c0_59, %c0_60], %160 {strides = array<i32>} : memref<1x8x32xf32, #tpu.memory_space<vmem>>, vector<1x8x32xf32>,
    return
  }
  func.func @transform_0(%arg0: i32) -> (i32, i32, i32) {
    %c0_i32 = arith.constant 0 : i32
    %c0_i32_0 = arith.constant 0 : i32
    %c0_i32_1 = arith.constant 0 : i32
    return %arg0, %c0_i32, %c0_i32_0 : i32, i32, i32
  }
  func.func @transform_1(%arg0: i32) -> (i32, i32, i32) {
    %c0_i32 = arith.constant 0 : i32
    %c0_i32_0 = arith.constant 0 : i32
    %c0_i32_1 = arith.constant 0 : i32
    return %arg0, %c0_i32, %c0_i32_0 : i32, i32, i32
  }
  func.func @transform_2(%arg0: i32) -> (i32, i32, i32) {
    %c0_i32 = arith.constant 0 : i32
    %c0_i32_0 = arith.constant 0 : i32
    %c0_i32_1 = arith.constant 0 : i32
    return %arg0, %c0_i32, %c0_i32_0 : i32, i32, i32
  }
  func.func @transform_3(%arg0: i32) -> (i32, i32) {
    %c0_i32 = arith.constant 0 : i32
    %c0_i32_0 = arith.constant 0 : i32
    %c0_i32_1 = arith.constant 0 : i32
    return %c0_i32, %c0_i32_0 : i32, i32
  }
  func.func @transform_4(%arg0: i32) -> (i32, i32) {
    %c0_i32 = arith.constant 0 : i32
    %c0_i32_0 = arith.constant 0 : i32
    %c0_i32_1 = arith.constant 0 : i32
    return %c0_i32, %c0_i32_0 : i32, i32
  }
  func.func @transform_5(%arg0: i32) -> (i32, i32) {
    %c0_i32 = arith.constant 0 : i32
    %c0_i32_0 = arith.constant 0 : i32
    %c0_i32_1 = arith.constant 0 : i32
    return %c0_i32, %c0_i32_0 : i32, i32
  }
  func.func @transform_6(%arg0: i32) -> (i32, i32) {
    %c0_i32 = arith.constant 0 : i32
    %c0_i32_0 = arith.constant 0 : i32
    %c0_i32_1 = arith.constant 0 : i32
    return %c0_i32, %c0_i32_0 : i32, i32
  }
  func.func @transform_7(%arg0: i32) -> (i32, i32) {
    %c0_i32 = arith.constant 0 : i32
    %c0_i32_0 = arith.constant 0 : i32
    %c0_i32_1 = arith.constant 0 : i32
    return %c0_i32, %c0_i32_0 : i32, i32
  }
  func.func @transform_8(%arg0: i32) -> (i32, i32) {
    %c0_i32 = arith.constant 0 : i32
    %c0_i32_0 = arith.constant 0 : i32
    %c0_i32_1 = arith.constant 0 : i32
    return %c0_i32, %c0_i32_0 : i32, i32
  }
  func.func @transform_9(%arg0: i32) -> (i32, i32) {
    %c0_i32 = arith.constant 0 : i32
    %c0_i32_0 = arith.constant 0 : i32
    %c0_i32_1 = arith.constant 0 : i32
    return %c0_i32, %c0_i32_0 : i32, i32
  }
  func.func @transform_10(%arg0: i32) -> (i32, i32) {
    %c0_i32 = arith.constant 0 : i32
    %c0_i32_0 = arith.constant 0 : i32
    %c0_i32_1 = arith.constant 0 : i32
    return %c0_i32, %c0_i32_0 : i32, i32
  }
  func.func @transform_11(%arg0: i32) -> (i32, i32, i32) {
    %c0_i32 = arith.constant 0 : i32
    %c0_i32_0 = arith.constant 0 : i32
    %c0_i32_1 = arith.constant 0 : i32
    return %arg0, %c0_i32, %c0_i32_0 : i32, i32, i32
  }
}

module attributes {stable_mosaic.version = 11 : i64} {
  func.func @_ffn_sublayer_kernel(%arg0: i32, %arg1: memref<16x32xf32, #tpu.memory_space<vmem>>, %arg2: memref<1x32xf32, #tpu.memory_space<vmem>>, %arg3: memref<1x32xf32, #tpu.memory_space<vmem>>, %arg4: memref<32x64xbf16, #tpu.memory_space<vmem>>, %arg5: memref<1x64xf32, #tpu.memory_space<vmem>>, %arg6: memref<64x32xbf16, #tpu.memory_space<vmem>>, %arg7: memref<1x32xf32, #tpu.memory_space<vmem>>, %arg8: memref<16x32xf32, #tpu.memory_space<vmem>>) attributes {dimension_semantics = [#tpu.dimension_semantics<parallel>], iteration_bounds = array<i64: 1>, scalar_prefetch = 0 : i64, scratch_operands = 0 : i64, tpu.core_type = #tpu.core_type<tc>, window_params = [{transform_indices = @transform_0, window_bounds = array<i64: 16, 32>}, {pipeline_mode = #tpu.pipeline_mode<synchronous>, transform_indices = @transform_1, window_bounds = array<i64: 1, 32>}, {pipeline_mode = #tpu.pipeline_mode<synchronous>, transform_indices = @transform_2, window_bounds = array<i64: 1, 32>}, {pipeline_mode = #tpu.pipeline_mode<synchronous>, transform_indices = @transform_3, window_bounds = array<i64: 32, 64>}, {pipeline_mode = #tpu.pipeline_mode<synchronous>, transform_indices = @transform_4, window_bounds = array<i64: 1, 64>}, {pipeline_mode = #tpu.pipeline_mode<synchronous>, transform_indices = @transform_5, window_bounds = array<i64: 64, 32>}, {pipeline_mode = #tpu.pipeline_mode<synchronous>, transform_indices = @transform_6, window_bounds = array<i64: 1, 32>}, {transform_indices = @transform_7, window_bounds = array<i64: 16, 32>}]} {
    %c0 = arith.constant 0 : index
    %c0_0 = arith.constant 0 : index
    %0 = vector.load %arg1[%c0, %c0_0] : memref<16x32xf32, #tpu.memory_space<vmem>>, vector<16x32xf32>
    %c0_1 = arith.constant 0 : index
    %c0_2 = arith.constant 0 : index
    %1 = vector.load %arg2[%c0_1, %c0_2] : memref<1x32xf32, #tpu.memory_space<vmem>>, vector<1x32xf32>
    %c0_3 = arith.constant 0 : index
    %c0_4 = arith.constant 0 : index
    %2 = vector.load %arg3[%c0_3, %c0_4] : memref<1x32xf32, #tpu.memory_space<vmem>>, vector<1x32xf32>
    %cst = arith.constant dense<0.000000e+00> : vector<16xf32>
    %3 = vector.multi_reduction <add>, %0, %cst [1] : vector<16x32xf32> to vector<16xf32>
    %4 = vector.shape_cast %3 : vector<16xf32> to vector<16x1xf32>
    %cst_5 = arith.constant 3.200000e+01 : f32
    %5 = vector.broadcast %cst_5 : f32 to vector<16x1xf32>
    %6 = arith.divf %4, %5 : vector<16x1xf32>
    %7 = vector.broadcast %6 : vector<16x1xf32> to vector<16x32xf32>
    %8 = arith.subf %0, %7 : vector<16x32xf32>
    %9 = arith.mulf %8, %8 : vector<16x32xf32>
    %cst_6 = arith.constant dense<0.000000e+00> : vector<16xf32>
    %10 = vector.multi_reduction <add>, %9, %cst_6 [1] : vector<16x32xf32> to vector<16xf32>
    %11 = vector.shape_cast %10 : vector<16xf32> to vector<16x1xf32>
    %cst_7 = arith.constant 0.0322580636 : f32
    %12 = vector.broadcast %cst_7 : f32 to vector<16x1xf32>
    %13 = arith.mulf %11, %12 : vector<16x1xf32>
    %cst_8 = arith.constant 9.99999997E-7 : f32
    %14 = vector.broadcast %cst_8 : f32 to vector<16x1xf32>
    %15 = arith.addf %13, %14 : vector<16x1xf32>
    %16 = math.rsqrt %15 : vector<16x1xf32>
    %17 = vector.broadcast %16 : vector<16x1xf32> to vector<16x32xf32>
    %18 = arith.mulf %8, %17 : vector<16x32xf32>
    %19 = vector.broadcast %1 : vector<1x32xf32> to vector<16x32xf32>
    %20 = arith.mulf %19, %18 : vector<16x32xf32>
    %21 = vector.broadcast %2 : vector<1x32xf32> to vector<16x32xf32>
    %22 = arith.addf %20, %21 : vector<16x32xf32>
    %23 = arith.truncf %22 : vector<16x32xf32> to vector<16x32xbf16>
    %c0_9 = arith.constant 0 : index
    %c0_10 = arith.constant 0 : index
    %24 = vector.load %arg4[%c0_9, %c0_10] : memref<32x64xbf16, #tpu.memory_space<vmem>>, vector<32x64xbf16>
    %cst_11 = arith.constant dense<0.000000e+00> : vector<16x64xf32>
    %25 = tpu.matmul %23, %24, %cst_11 {dimension_numbers = #tpu.dot_dimension_numbers<[1], [0], [0], [1], [0, 0, 1, 1], [], []>} : vector<16x32xbf16>, vector<32x64xbf16>, vector<16x64xf32> -> vector<16x64xf32>
    %c0_12 = arith.constant 0 : index
    %c0_13 = arith.constant 0 : index
    %26 = vector.load %arg5[%c0_12, %c0_13] : memref<1x64xf32, #tpu.memory_space<vmem>>, vector<1x64xf32>
    %27 = vector.broadcast %26 : vector<1x64xf32> to vector<16x64xf32>
    %28 = arith.addf %25, %27 : vector<16x64xf32>
    %cst_14 = arith.constant 0.000000e+00 : f32
    %29 = vector.broadcast %cst_14 : f32 to vector<16x64xf32>
    %30 = arith.maximumf %28, %29 : vector<16x64xf32>
    %31 = arith.truncf %30 : vector<16x64xf32> to vector<16x64xbf16>
    %c0_15 = arith.constant 0 : index
    %c0_16 = arith.constant 0 : index
    %32 = vector.load %arg6[%c0_15, %c0_16] : memref<64x32xbf16, #tpu.memory_space<vmem>>, vector<64x32xbf16>
    %cst_17 = arith.constant dense<0.000000e+00> : vector<16x32xf32>
    %33 = tpu.matmul %31, %32, %cst_17 {dimension_numbers = #tpu.dot_dimension_numbers<[1], [0], [0], [1], [0, 0, 1, 1], [], []>} : vector<16x64xbf16>, vector<64x32xbf16>, vector<16x32xf32> -> vector<16x32xf32>
    %c0_18 = arith.constant 0 : index
    %c0_19 = arith.constant 0 : index
    %34 = vector.load %arg7[%c0_18, %c0_19] : memref<1x32xf32, #tpu.memory_space<vmem>>, vector<1x32xf32>
    %35 = vector.broadcast %34 : vector<1x32xf32> to vector<16x32xf32>
    %36 = arith.addf %33, %35 : vector<16x32xf32>
    %37 = arith.addf %0, %36 : vector<16x32xf32>
    %c0_20 = arith.constant 0 : index
    %c0_21 = arith.constant 0 : index
    %38 = vector.load %arg8[%c0_20, %c0_21] : memref<16x32xf32, #tpu.memory_space<vmem>>, vector<16x32xf32>
    tpu.vector_store %arg8[%c0_20, %c0_21], %37 {strides = array<i32>} : memref<16x32xf32, #tpu.memory_space<vmem>>, vector<16x32xf32>,
    return
  }
  func.func @transform_0(%arg0: i32) -> (i32, i32) {
    %c0_i32 = arith.constant 0 : i32
    %c0_i32_0 = arith.constant 0 : i32
    return %arg0, %c0_i32 : i32, i32
  }
  func.func @transform_1(%arg0: i32) -> (i32, i32) {
    %c0_i32 = arith.constant 0 : i32
    %c0_i32_0 = arith.constant 0 : i32
    %c0_i32_1 = arith.constant 0 : i32
    return %c0_i32, %c0_i32_0 : i32, i32
  }
  func.func @transform_2(%arg0: i32) -> (i32, i32) {
    %c0_i32 = arith.constant 0 : i32
    %c0_i32_0 = arith.constant 0 : i32
    %c0_i32_1 = arith.constant 0 : i32
    return %c0_i32, %c0_i32_0 : i32, i32
  }
  func.func @transform_3(%arg0: i32) -> (i32, i32) {
    %c0_i32 = arith.constant 0 : i32
    %c0_i32_0 = arith.constant 0 : i32
    %c0_i32_1 = arith.constant 0 : i32
    return %c0_i32, %c0_i32_0 : i32, i32
  }
  func.func @transform_4(%arg0: i32) -> (i32, i32) {
    %c0_i32 = arith.constant 0 : i32
    %c0_i32_0 = arith.constant 0 : i32
    %c0_i32_1 = arith.constant 0 : i32
    return %c0_i32, %c0_i32_0 : i32, i32
  }
  func.func @transform_5(%arg0: i32) -> (i32, i32) {
    %c0_i32 = arith.constant 0 : i32
    %c0_i32_0 = arith.constant 0 : i32
    %c0_i32_1 = arith.constant 0 : i32
    return %c0_i32, %c0_i32_0 : i32, i32
  }
  func.func @transform_6(%arg0: i32) -> (i32, i32) {
    %c0_i32 = arith.constant 0 : i32
    %c0_i32_0 = arith.constant 0 : i32
    %c0_i32_1 = arith.constant 0 : i32
    return %c0_i32, %c0_i32_0 : i32, i32
  }
  func.func @transform_7(%arg0: i32) -> (i32, i32) {
    %c0_i32 = arith.constant 0 : i32
    %c0_i32_0 = arith.constant 0 : i32
    return %arg0, %c0_i32 : i32, i32
  }
}

module attributes {stable_mosaic.version = 11 : i64} {
  func.func @_final_ln_kernel(%arg0: i32, %arg1: memref<16x32xf32, #tpu.memory_space<vmem>>, %arg2: memref<1x32xf32, #tpu.memory_space<vmem>>, %arg3: memref<1x32xf32, #tpu.memory_space<vmem>>, %arg4: memref<16x32xf32, #tpu.memory_space<vmem>>) attributes {dimension_semantics = [#tpu.dimension_semantics<parallel>], iteration_bounds = array<i64: 1>, scalar_prefetch = 0 : i64, scratch_operands = 0 : i64, tpu.core_type = #tpu.core_type<tc>, window_params = [{transform_indices = @transform_0, window_bounds = array<i64: 16, 32>}, {pipeline_mode = #tpu.pipeline_mode<synchronous>, transform_indices = @transform_1, window_bounds = array<i64: 1, 32>}, {pipeline_mode = #tpu.pipeline_mode<synchronous>, transform_indices = @transform_2, window_bounds = array<i64: 1, 32>}, {transform_indices = @transform_3, window_bounds = array<i64: 16, 32>}]} {
    %c0 = arith.constant 0 : index
    %c0_0 = arith.constant 0 : index
    %0 = vector.load %arg1[%c0, %c0_0] : memref<16x32xf32, #tpu.memory_space<vmem>>, vector<16x32xf32>
    %c0_1 = arith.constant 0 : index
    %c0_2 = arith.constant 0 : index
    %1 = vector.load %arg2[%c0_1, %c0_2] : memref<1x32xf32, #tpu.memory_space<vmem>>, vector<1x32xf32>
    %c0_3 = arith.constant 0 : index
    %c0_4 = arith.constant 0 : index
    %2 = vector.load %arg3[%c0_3, %c0_4] : memref<1x32xf32, #tpu.memory_space<vmem>>, vector<1x32xf32>
    %cst = arith.constant dense<0.000000e+00> : vector<16xf32>
    %3 = vector.multi_reduction <add>, %0, %cst [1] : vector<16x32xf32> to vector<16xf32>
    %4 = vector.shape_cast %3 : vector<16xf32> to vector<16x1xf32>
    %cst_5 = arith.constant 3.200000e+01 : f32
    %5 = vector.broadcast %cst_5 : f32 to vector<16x1xf32>
    %6 = arith.divf %4, %5 : vector<16x1xf32>
    %7 = vector.broadcast %6 : vector<16x1xf32> to vector<16x32xf32>
    %8 = arith.subf %0, %7 : vector<16x32xf32>
    %9 = arith.mulf %8, %8 : vector<16x32xf32>
    %cst_6 = arith.constant dense<0.000000e+00> : vector<16xf32>
    %10 = vector.multi_reduction <add>, %9, %cst_6 [1] : vector<16x32xf32> to vector<16xf32>
    %11 = vector.shape_cast %10 : vector<16xf32> to vector<16x1xf32>
    %cst_7 = arith.constant 0.0322580636 : f32
    %12 = vector.broadcast %cst_7 : f32 to vector<16x1xf32>
    %13 = arith.mulf %11, %12 : vector<16x1xf32>
    %cst_8 = arith.constant 9.99999997E-7 : f32
    %14 = vector.broadcast %cst_8 : f32 to vector<16x1xf32>
    %15 = arith.addf %13, %14 : vector<16x1xf32>
    %16 = math.rsqrt %15 : vector<16x1xf32>
    %17 = vector.broadcast %16 : vector<16x1xf32> to vector<16x32xf32>
    %18 = arith.mulf %8, %17 : vector<16x32xf32>
    %19 = vector.broadcast %1 : vector<1x32xf32> to vector<16x32xf32>
    %20 = arith.mulf %19, %18 : vector<16x32xf32>
    %21 = vector.broadcast %2 : vector<1x32xf32> to vector<16x32xf32>
    %22 = arith.addf %20, %21 : vector<16x32xf32>
    %c0_9 = arith.constant 0 : index
    %c0_10 = arith.constant 0 : index
    %23 = vector.load %arg4[%c0_9, %c0_10] : memref<16x32xf32, #tpu.memory_space<vmem>>, vector<16x32xf32>
    tpu.vector_store %arg4[%c0_9, %c0_10], %22 {strides = array<i32>} : memref<16x32xf32, #tpu.memory_space<vmem>>, vector<16x32xf32>,
    return
  }
  func.func @transform_0(%arg0: i32) -> (i32, i32) {
    %c0_i32 = arith.constant 0 : i32
    %c0_i32_0 = arith.constant 0 : i32
    return %arg0, %c0_i32 : i32, i32
  }
  func.func @transform_1(%arg0: i32) -> (i32, i32) {
    %c0_i32 = arith.constant 0 : i32
    %c0_i32_0 = arith.constant 0 : i32
    %c0_i32_1 = arith.constant 0 : i32
    return %c0_i32, %c0_i32_0 : i32, i32
  }
  func.func @transform_2(%arg0: i32) -> (i32, i32) {
    %c0_i32 = arith.constant 0 : i32
    %c0_i32_0 = arith.constant 0 : i32
    %c0_i32_1 = arith.constant 0 : i32
    return %c0_i32, %c0_i32_0 : i32, i32
  }
  func.func @transform_3(%arg0: i32) -> (i32, i32) {
    %c0_i32 = arith.constant 0 : i32
    %c0_i32_0 = arith.constant 0 : i32
    return %arg0, %c0_i32 : i32, i32
  }
}

</mosaic_0001>

<bundles_post_ra>
// kernel: decoder_forward.9
= control target key start
LH: loop header
LB: loop body
LE: loop exit
PB: predicated region body
PF: predicated region fallthrough
CT: control target
= control target key end

     0   :  { %vm31_vm0 = vcmask 261120   ;;  %v290_v15 = vmov 0.0   ;;  %vm291_vm1 = vmmov 0   ;;  %vm185_vm2 = vcmask 523264   ;;  %s391_s0 = inlined_call_operand.vmem [shape: f32[16,32], index: 0, kind: input, shape index: {}]   ;;  %s392_s3 = inlined_call_operand.vmem [shape: bf16[32,64], index: 3, kind: input, shape index: {}]   ;;  %s393_s5 = inlined_call_operand.vmem [shape: bf16[64,32], index: 5, kind: input, shape index: {}]   ;;  %s394_s1 = inlined_call_operand.vmem [shape: f32[1,32], index: 1, kind: input, shape index: {}]   ;;  %s395_s2 = inlined_call_operand.vmem [shape: f32[1,32], index: 2, kind: input, shape index: {}]   ;;  %s396_s4 = inlined_call_operand.vmem [shape: f32[1,64], index: 4, kind: input, shape index: {}]   ;;  %s397_s6 = inlined_call_operand.vmem [shape: f32[1,32], index: 6, kind: input, shape index: {}]   ;;  %s398_s7 = inlined_call_operand.vmem [shape: f32[16,32], index: 7, kind: output, shape index: {}]  }
   0x1   :  { %v335_v0 = vld [vmem:[%s391_s0] sm:$0xff]  ;;  %v340_v1 = vld [vmem:[%s391_s0 + $0x8] sm:$0xff]  ;;  %258 = vmatprep.subr.bf16.mxu0 %v290_v15  ;;  %266 = vmatprep.subr.bf16.mxu1 %v290_v15  ;;  %v284_v36 = vld [vmem:[%s393_s5 + $0x10] sm:$0xff]  }
   0x2   :  { %v32_v2 = vsel %vm31_vm0, %v335_v0, 0.0  ;;  %v35_v3 = vsel %vm31_vm0, %v340_v1, 0.0  ;;  %v280_v14 = vld [vmem:[%s392_s3] sm:$0xff]   ;;  %v281_v16 = vld [vmem:[%s392_s3 + $0x8] sm:$0xff]   ;;  %262 = vmatprep.mubr.msk.bf16.mxu0 %vm291_vm1, %v290_v15  ;;  %274 = vmatprep.mubr.msk.bf16.mxu1 %vm291_vm1, %v290_v15  ;;  %v285_v37 = vld [vmem:[%s393_s5 + $0x18] sm:$0xff]  }
   0x3   :  { %33 = vadd.xlane.f32.xlu0 %v32_v2  ;;  %259 = vmatpush3.bf16.msra.mxu0 %v280_v14  ;;  %v282_v17 = vld [vmem:[%s393_s5] sm:$0xff]   ;;  %v283_v18 = vld [vmem:[%s393_s5 + $0x8] sm:$0xff]  }
   0x4   :  { %260 = vmatprep.subr.bf16.mxu0 %v290_v15  ;;  %267 = vmatpush3.bf16.msra.mxu1 %v282_v17  ;;  %v238_v27 = vld [vmem:[%s394_s1] ss:$0 sm:$0xff] }
   0x5   :  { %268 = vmatprep.subr.bf16.mxu1 %v290_v15  ;;  %v239_v31 = vld [vmem:[%s395_s2] ss:$0 sm:$0xff] }
   0x6   :  { %v240_v38 = vld [vmem:[%s396_s4] ss:$0 sm:$0xff] }
   0x7   :  { %36 = vadd.xlane.f32.xlu0 %v35_v3  ;;  %261 = vmatpush3.bf16.msra.mxu0 %v281_v16  ;;  %v244_v48 = vld [vmem:[%s397_s6] ss:$0 sm:$0xff] }
   0x8   :  { %269 = vmatpush3.bf16.msra.mxu1 %v283_v18 }
   0x9   :  { %270 = vmatprep.subr.bf16.mxu1 %v290_v15 }
   0xc   :  { %271 = vmatpush3.bf16.msra.mxu1 %v284_v36 }
   0xd   :  { %272 = vmatprep.subr.bf16.mxu1 %v290_v15 }
  0x10   :  { %273 = vmatpush3.bf16.msra.mxu1 %v285_v37 }
  0x90   :  { %v34_v4 = vpop.xlane.xlu0 %33 }
  0x91   :  { %v39_v5 = vmul.f32 0.03125, %v34_v4 }
  0x93   :  { %v41_v6 = vsub.f32 %v335_v0, %v39_v5 }
  0x94   :  { %v37_v7 = vpop.xlane.xlu0 %36 }
  0x95   :  { %v40_v8 = vmul.f32 0.03125, %v37_v7  ;;  %v43_v9 = vmul.f32 %v41_v6, %v41_v6 }
  0x97   :  { %v42_v10 = vsub.f32 %v340_v1, %v40_v8  ;;  %v45_v11 = vsel %vm31_vm0, %v43_v9, 0.0 }
  0x98   :  { %46 = vadd.xlane.f32.xlu1 %v45_v11 }
  0x99   :  { %v44_v12 = vmul.f32 %v42_v10, %v42_v10 }
  0x9b   :  { %v48_v13 = vsel %vm31_vm0, %v44_v12, 0.0 }
  0x9c   :  { %49 = vadd.xlane.f32.xlu1 %v48_v13 }
 0x125   :  { %v47_v19 = vpop.xlane.xlu1 %46 }
 0x126   :  { %v51_v20 = vmul.f32 0.032258064, %v47_v19 }
 0x128   :  { %v53_v21 = vadd.f32 1e-06, %v51_v20 }
 0x129   :  { %v50_v22 = vpop.xlane.xlu1 %49 }
 0x12a   :  { %286 = vrsqrt.f32 %v53_v21  ;;  %v52_v23 = vmul.f32 0.032258064, %v50_v22 }
 0x12c   :  { %v54_v24 = vadd.f32 1e-06, %v52_v23 }
 0x12e   :  { %288 = vrsqrt.f32 %v54_v24 }
 0x134   :  { %v287_v25 = vpop.eup %286 }
 0x135   :  { %v57_v26 = vmul.f32 %v287_v25, %v41_v6 }
 0x137   :  { %v65_v30 = vmul.f32 %v238_v27, %v57_v26 }
 0x138   :  { %v289_v28 = vpop.eup %288 }
 0x139   :  { %v58_v29 = vmul.f32 %v289_v28, %v42_v10  ;;  %v73_v33 = vadd.f32 %v239_v31, %v65_v30 }
 0x13b   :  { %v66_v32 = vmul.f32 %v238_v27, %v58_v29 }
 0x13d   :  { %v74_v34 = vadd.f32 %v239_v31, %v66_v32 }
 0x13f   :  { %v75_v35 = vpack.c.bf16 %v74_v34, %v73_v33 }
 0x141   :  { %263 = vmatmul.mubr.msk.bf16.vlgmr.msra.gmra.mrb[0].mxu0 %vm31_vm0, %v75_v35 }
 0x214   :  { %v136_v39 = vpop.f32.mrb[0].mxu0 }
 0x215   :  { %v137_v40 = vadd.f32 %v240_v38, %v136_v39  ;;  %v264_v41 = vpop.f32.mrb[1].mxu0 }
 0x216   :  { %v139_v42 = vpop.f32.mrb[2].mxu0 }
 0x217   :  { %v140_v43 = vadd.f32 %v240_v38, %v139_v42  ;;  %v265_v44 = vpop.f32.mrb[3].mxu0  ;;  %v143_v45 = vmax.f32 %v137_v40, 0.0 }
 0x219   :  { %v144_v46 = vmax.f32 %v140_v43, 0.0 }
 0x21b   :  { %v145_v47 = vpack.c.bf16 %v144_v46, %v143_v45 }
 0x21d   :  { %275 = vmatmul.mubr.msk.bf16.vlgmr.msra.gmra.mrb[0].mxu1 %vm185_vm2, %v145_v47 }
 0x2f0   :  { %v223_v49 = vpop.f32.mrb[0].mxu1 }
 0x2f1   :  { %v224_v50 = vadd.f32 %v244_v48, %v223_v49  ;;  %v276_v51 = vpop.f32.mrb[1].mxu1 }
 0x2f2   :  { %v226_v52 = vpop.f32.mrb[2].mxu1 }
 0x2f3   :  { %v230_v53 = vadd.f32 %v224_v50, %v335_v0  ;;  %v227_v54 = vadd.f32 %v244_v48, %v226_v52  ;;  %v277_v55 = vpop.f32.mrb[3].mxu1 }
 0x2f5   :  { %232 = vst.msk [vmem:[%s398_s7] sm:$0xff] %vm31_vm0, %v230_v53  ;;  %v231_v56 = vadd.f32 %v227_v54, %v340_v1 }
 0x2f7   :  { %233 = vst.msk [vmem:[%s398_s7 + $0x8] sm:$0xff] %vm31_vm0, %v231_v56 }

// kernel: decoder_forward.13
= control target key start
LH: loop header
LB: loop body
LE: loop exit
PB: predicated region body
PF: predicated region fallthrough
CT: control target
= control target key end

     0   :  { %vm19_vm0 = vcmask 261120   ;;  %s167_s0 = inlined_call_operand.vmem [shape: f32[16,32], index: 0, kind: input, shape index: {}]   ;;  %s168_s1 = inlined_call_operand.vmem [shape: f32[1,32], index: 1, kind: input, shape index: {}]   ;;  %s169_s2 = inlined_call_operand.vmem [shape: f32[1,32], index: 2, kind: input, shape index: {}]   ;;  %s170_s3 = inlined_call_operand.hbm [shape: f32[16,32], index: 3, kind: output, shape index: {}]  }
   0x1   :  { %v15_v0 = vld [vmem:[%s167_s0] sm:$0xff]  ;;  %v16_v1 = vld [vmem:[%s167_s0 + $0x8] sm:$0xff] }
   0x2   :  { %8 = vsyncpa [#allocation3], 0  ;;  %v20_v2 = vsel %vm19_vm0, %v15_v0, 0.0  ;;  %v23_v3 = vsel %vm19_vm0, %v16_v1, 0.0  ;;  %v81_v21 = vld [vmem:[%s168_s1] ss:$0 sm:$0xff] }
   0x3   :  { %21 = vadd.xlane.f32.xlu0 %v20_v2  ;;  %v82_v23 = vld [vmem:[%s169_s2] ss:$0 sm:$0xff]  ;;  %s114_s19 = smov [#allocation2]  }
   0x4   :  { %s70_s20 = sshll.u32 %s114_s19, 4  ;;  %s71_s20 = int_to_ptr.vmem [resolvable:$true] %s70_s20 }
   0x5   :  { %s90_s21 = scalar_lea.vmem %s71_s20, 256  ;;  %p95_p1 = scmp.lt.s32.totalorder %s71_s20, %s71_s20 }
   0x6   :  { %p91_p0 = scmp.ne.s32.totalorder %s71_s20, %s90_s21  ;;  %p96_p2 = scmp.lt.s32.totalorder %s90_s21, %s90_s21 }
   0x7   :  { %24 = vadd.xlane.f32.xlu0 %v23_v3 }
   0x8   :  { %p97_p3 = por %p96_p2, %p95_p1 }
   0xa   :  { %p98_p4 = pnand %p97_p3, %p91_p0 }
  0x90   :  { %v22_v4 = vpop.xlane.xlu0 %21 }
  0x91   :  { %v27_v5 = vmul.f32 0.03125, %v22_v4 }
  0x93   :  { %v29_v6 = vsub.f32 %v15_v0, %v27_v5 }
  0x94   :  { %v25_v7 = vpop.xlane.xlu0 %24 }
  0x95   :  { %v28_v8 = vmul.f32 0.03125, %v25_v7  ;;  %v31_v9 = vmul.f32 %v29_v6, %v29_v6 }
  0x97   :  { %v30_v10 = vsub.f32 %v16_v1, %v28_v8  ;;  %v33_v11 = vsel %vm19_vm0, %v31_v9, 0.0 }
  0x98   :  { %34 = vadd.xlane.f32.xlu1 %v33_v11 }
  0x99   :  { %v32_v12 = vmul.f32 %v30_v10, %v30_v10 }
  0x9b   :  { %v36_v13 = vsel %vm19_vm0, %v32_v12, 0.0 }
  0x9c   :  { %37 = vadd.xlane.f32.xlu1 %v36_v13 }
 0x125   :  { %v35_v14 = vpop.xlane.xlu1 %34 }
 0x126   :  { %v39_v15 = vmul.f32 0.032258064, %v35_v14 }
 0x128   :  { %v41_v16 = vadd.f32 1e-06, %v39_v15 }
 0x129   :  { %v38_v17 = vpop.xlane.xlu1 %37 }
 0x12a   :  { %86 = vrsqrt.f32 %v41_v16  ;;  %v40_v18 = vmul.f32 0.032258064, %v38_v17 }
 0x12c   :  { %v42_v19 = vadd.f32 1e-06, %v40_v18 }
 0x12e   :  { %88 = vrsqrt.f32 %v42_v19 }
 0x134   :  { %v87_v20 = vpop.eup %86 }
 0x135   :  { %v45_v22 = vmul.f32 %v87_v20, %v29_v6 }
 0x137   :  { %v53_v24 = vmul.f32 %v81_v21, %v45_v22 }
 0x138   :  { %v89_v25 = vpop.eup %88 }
 0x139   :  { %v46_v26 = vmul.f32 %v89_v25, %v30_v10  ;;  %v61_v27 = vadd.f32 %v82_v23, %v53_v24 }
 0x13b   :  { %v54_v28 = vmul.f32 %v81_v21, %v46_v26  ;;  %63 = vst.msk [vmem:[#allocation2] sm:$0xff] %vm19_vm0, %v61_v27 }
 0x13d   :  { %v62_v29 = vadd.f32 %v82_v23, %v54_v28 }
 0x13f   :  { %64 = vst.msk [vmem:[#allocation2 + $0x8] sm:$0xff] %vm19_vm0, %v62_v29 }
 0x140   :  { %101 = shalt.err (!%p98_p4)
}
 0x141   :  { %s102_s22 = scalar_lea.hbm %s170_s3, 256 }
 0x142   :  { %p103_p5 = scmp.ne.s32.totalorder %s170_s3, %s102_s22  ;;  %p106_p6 = scmp.lt.u32.totalorder %s102_s22, %s170_s3 }
 0x144   :  { %p108_p7 = pnand %p106_p6, %p103_p5 }
 0x146   :  { %111 = shalt.err (!%p108_p7)
}
 0x147   :  { %s115_s27 = smov 128   ;;  %s116_s28 = smov 8  }
 0x148   :  { %76 = dma.vmem_to_hbm [thread:$0]  %s71_s20, 256, %s170_s3, [#allocation3], %s115_s27, %s115_s27, %s116_s28  }
 0x149   :  { %112 = dma.done.wait [#allocation3], 256  }
 0x14a   :  { %113 = vsyncadd [#allocation3], 4294967040 }
 0x14b   :  { %80 = vsyncpa [#allocation3], 1 }

// kernel: decoder_forward.7
= control target key start
LH: loop header
LB: loop body
LE: loop exit
PB: predicated region body
PF: predicated region fallthrough
CT: control target
= control target key end

     0   :  { %s1250_s27 = smov 0   ;;  %s1384_s0 = inlined_call_operand.vmem [shape: f32[2,8,32], index: 0, kind: input, shape index: {}]   ;;  %s1385_s1 = inlined_call_operand.vmem [shape: s32[2,8,8], index: 1, kind: input, shape index: {}]   ;;  %s1386_s2 = inlined_call_operand.vmem [shape: f32[1,32], index: 2, kind: input, shape index: {}]   ;;  %s1387_s3 = inlined_call_operand.vmem [shape: f32[1,32], index: 3, kind: input, shape index: {}]   ;;  %s1388_s4 = inlined_call_operand.vmem [shape: bf16[32,96], index: 4, kind: input, shape index: {}]   ;;  %s1389_s5 = inlined_call_operand.vmem [shape: f32[1,96], index: 5, kind: input, shape index: {}]   ;;  %s1390_s6 = inlined_call_operand.vmem [shape: bf16[32,32], index: 6, kind: input, shape index: {}]   ;;  %s1391_s7 = inlined_call_operand.vmem [shape: f32[1,32], index: 7, kind: input, shape index: {}]   ;;  %s1392_s8 = inlined_call_operand.vmem [shape: f32[2,8,32], index: 8, kind: output, shape index: {}]  }
   0x1 LB: > { %s1021_s28 = sadd.s32 4294967295, %s1187_s27   ;;  %p1025_p0 = scmp.ge.s32.totalorder %s1187_s27, 1  ;;  %s1187_s27 = sphi %s1250_s27, %s18_s27  }
   0x2   : > { %p270_p1 = scmp.lt.s32.totalorder %s1187_s27, 3 }
   0x4   : > { %p271_p2 = pnand %p1025_p0, %p270_p1 }
   0x5   : > { %p306_p3 = scmp.lt.s32.totalorder (!%p271_p2), %s1021_s28, 1  ;;  %vm322_vm0 = vcmask (!%p271_p2), 261120   ;;  %v1159_v7 = vld [vmem:[%s1388_s4] sm:$0xff] (!%p271_p2)   ;;  %v1189_v8 = vmov (!%p271_p2), 0.0   ;;  %vm1190_vm1 = vmmov (!%p271_p2), 0   ;;  %v1160_v9 = vld [vmem:[%s1388_s4 + $0x8] sm:$0xff] (!%p271_p2)  }
   0x6   : > { %274 = sbr.rel (%p271_p2) target bundleno = 1810 (0x712), region = 52  ;;  %1071 = vmatprep.subr.bf16.mxu0 (!%p271_p2), %v1189_v8  ;;  %1075 = vmatprep.mubr.msk.bf16.mxu0 (!%p271_p2), %vm1190_vm1, %v1189_v8  ;;  %v1029_v14 = vld [vmem:[%s1386_s2] ss:$0 sm:$0xff] (!%p271_p2)  ;;  %s1191_s21 = smov (!%p271_p2), 120   ;;  %vm423_vm2 = vcmask (!%p271_p2), 64512   ;;  %vm490_vm4 = vcmask (!%p271_p2), 1043456  }
   0x7   : > { %1072 = vmatpush3.bf16.msra.mxu0 (!%p271_p2), %v1159_v7  ;;  %1079 = vmatprep.subr.bf16.mxu1 (!%p271_p2), %v1189_v8  ;;  %v1030_v16 = vld [vmem:[%s1387_s3] ss:$0 sm:$0xff] (!%p271_p2)  ;;  %s1192_s22 = smov (!%p271_p2), 96   ;;  %s1193_s23 = smov (!%p271_p2), 88   ;;  %vm883_vm5 = vcmask (!%p271_p2), 130048   ;;  %vm885_vm6 = vcmask (!%p271_p2), 195584  }
   0x8   : > { %1073 = vmatprep.subr.bf16.mxu0 (!%p271_p2), %v1189_v8  ;;  %1081 = vmatprep.mubr.msk.bf16.mxu1 (!%p271_p2), %vm1190_vm1, %v1189_v8  ;;  %v1031_v20 = vld [vmem:[%s1389_s5] ss:$0 sm:$0xff] (!%p271_p2)  ;;  %s1194_s24 = smov (!%p271_p2), 80   ;;  %s1195_s25 = smov (!%p271_p2), 112  }
   0x9   : > { %s1196_s26 = smov (!%p271_p2), 72   ;;  %s1198_s11 = smov (!%p271_p2), 64  }
   0xa   : > { %s1199_s12 = smov (!%p271_p2), 56   ;;  %s1200_s13 = smov (!%p271_p2), 48  }
   0xb   : > { %1074 = vmatpush3.bf16.msra.mxu0 (!%p271_p2), %v1160_v9  ;;  %s1201_s14 = smov (!%p271_p2), 40   ;;  %s1202_s15 = smov (!%p271_p2), 8  }
   0xc   : > { %1085 = vmatprep.subr.bf16.mxu0 (!%p271_p2), %v1189_v8  ;;  %s1203_s20 = smov (!%p271_p2), 16  }
   0xd   : > { %s1394_s28 = smov (!%p306_p3, %s1021_s28), 1 }
   0xe   : > { %s1258_s29 = sshll.u32 %s1394_s28, 3  ;;  %s1197_s28 = smov 104  }
   0xf   : > { %s309_s10 = scalar_lea.vmem %s1384_s0, %s1258_s29 }
  0x10   : > { %v1264_v0 = vld [vmem:[%s309_s10] sm:$0xff]  ;;  %s313_s10 = scalar_lea.vmem %s1385_s1, %s1258_s29 }
  0x11   : > { %v323_v1 = vsel %vm322_vm0, %v1264_v0, 0.0  ;;  %v418_v38 = vld [vmem:[%s313_s10] sm:$0xff] }
  0x12   : > { %324 = vadd.xlane.f32.xlu0 %v323_v1  ;;  %vm471_vm3 = vcmp.eq.s32.totalorder %v418_v38, 0 }
  0x9f   : > { %v325_v2 = vpop.xlane.xlu0 %324 }
  0xa0   : > { %v327_v3 = vmul.f32 0.03125, %v325_v2 }
  0xa2   : > { %v328_v4 = vsub.f32 %v1264_v0, %v327_v3 }
  0xa4   : > { %v329_v5 = vmul.f32 %v328_v4, %v328_v4 }
  0xa6   : > { %v330_v6 = vsel %vm322_vm0, %v329_v5, 0.0 }
  0xa7   : > { %331 = vadd.xlane.f32.xlu0 %v330_v6 }
 0x134   : > { %v332_v10 = vpop.xlane.xlu0 %331 }
 0x135   : > { %v333_v11 = vmul.f32 0.032258064, %v332_v10 }
 0x137   : > { %v334_v12 = vadd.f32 1e-06, %v333_v11 }
 0x139   : > { %1163 = vrsqrt.f32 %v334_v12 }
 0x143   : > { %v1164_v13 = vpop.eup %1163 }
 0x144   : > { %v336_v15 = vmul.f32 %v1164_v13, %v328_v4 }
 0x146   : > { %v343_v17 = vmul.f32 %v1029_v14, %v336_v15 }
 0x148   : > { %v350_v18 = vadd.f32 %v1030_v16, %v343_v17 }
 0x14a   : > { %v351_v19 = vpack.c.bf16 %v350_v18, %v350_v18 }
 0x14c   : > { %1076 = vmatmul.mubr.msk.bf16.vlgmr.msra.gmra.mrb[0].mxu0 %vm322_vm0, %v351_v19 }
 0x14d   : > { %1087 = vmatprep.mubr.msk.bf16.mxu0 %vm1190_vm1, %v1189_v8 }
 0x21f   : > { %v412_v21 = vpop.f32.mrb[0].mxu0 }
 0x220   : > { %v413_v22 = vadd.f32 %v1031_v20, %v412_v21  ;;  %v1077_v23 = vpop.f32.mrb[1].mxu0 }
 0x221   : > { %v415_v24 = vpop.f32.mrb[2].mxu0 }
 0x222   : > { %v1296_v25 = vpack.c.bf16 %v413_v22, %v413_v22  ;;  %v1078_v26 = vpop.f32.mrb[3].mxu0 }
 0x224   : > { %534 = vrot.lane.b32.xlu0 %v1296_v25, %s1191_s21  ;;  %421 = vrot.lane.b32.xlu1 %v1296_v25, %s1192_s22  ;;  %s1204_s21 = smov 24  }
 0x228   : > { %536 = vrot.lane.b32.xlu1 %v1296_v25, %s1193_s23 }
 0x22c   : > { %648 = vrot.lane.b32.xlu1 %v1296_v25, %s1194_s24 }
 0x230   : > { %646 = vrot.lane.b32.xlu1 %v1296_v25, %s1195_s25 }
 0x234   : > { %760 = vrot.lane.b32.xlu1 %v1296_v25, %s1196_s26  ;;  %s317_s26 = scalar_lea.vmem %s1392_s8, %s1258_s29 }
 0x238   : > { %758 = vrot.lane.b32.xlu1 %v1296_v25, %s1197_s28 }
 0x296   : > { %v422_v27 = vpop.permute.xlu1 %421  ;;  %v535_v32 = vpop.permute.xlu0 %534 }
 0x297   : > { %v428_v28 = vsel %vm423_vm2, %v422_v27, 0 }
 0x298   : > { %1080 = vmatpush3.bf16.xpose.msra.mxu1 %v428_v28 }
 0x299   : > { %1091 = vmatprep.subr.bf16.mxu1 %v1189_v8 }
 0x29a   : > { %v537_v29 = vpop.permute.xlu1 %536 }
 0x29b   : > { %v542_v30 = vsel %vm423_vm2, %v537_v29, 0 }
 0x29e   : > { %v649_v31 = vpop.permute.xlu1 %648 }
 0x29f   : > { %1082 = vmatmul.mubr.msk.bf16.vlgmr.msra.gmra.mrb[0].mxu1 %vm423_vm2, %v1296_v25  ;;  %v654_v34 = vsel %vm423_vm2, %v649_v31, 0 }
 0x2a0   : > { %1092 = vmatpush3.bf16.xpose.msra.mxu1 %v542_v30  ;;  %1093 = vmatprep.mubr.msk.bf16.mxu1 %vm1190_vm1, %v1189_v8 }
 0x2a1   : > { %1103 = vmatprep.subr.bf16.mxu1 %v1189_v8 }
 0x2a2   : > { %v647_v33 = vpop.permute.xlu1 %646 }
 0x2a6   : > { %v761_v35 = vpop.permute.xlu1 %760 }
 0x2a7   : > { %1094 = vmatmul.mubr.msk.bf16.vlgmr.msra.gmra.mrb[4].mxu1 %vm423_vm2, %v535_v32  ;;  %v766_v36 = vsel %vm423_vm2, %v761_v35, 0 }
 0x2a8   : > { %1104 = vmatpush3.bf16.xpose.msra.mxu1 %v654_v34  ;;  %1105 = vmatprep.mubr.msk.bf16.mxu1 %vm1190_vm1, %v1189_v8 }
 0x2a9   : > { %1115 = vmatprep.subr.bf16.mxu1 %v1189_v8 }
 0x2aa   : > { %v759_v37 = vpop.permute.xlu1 %758 }
 0x2af   : > { %1106 = vmatmul.mubr.msk.bf16.vlgmr.msra.gmra.mrb[8].mxu1 %vm423_vm2, %v647_v33 }
 0x2b0   : > { %1116 = vmatpush3.bf16.xpose.msra.mxu1 %v766_v36  ;;  %1117 = vmatprep.mubr.msk.bf16.mxu1 %vm1190_vm1, %v1189_v8 }
 0x2b1   : > { %1127 = vmatprep.subr.bf16.mxu1 %v1189_v8 }
 0x2b7   : > { %1118 = vmatmul.mubr.msk.bf16.vlgmr.msra.gmra.mrb[12].mxu1 %vm423_vm2, %v759_v37 }
 0x2b8   : > { %1131 = vmatprep.mubr.msk.bf16.mxu1 %vm1190_vm1, %v1189_v8 }
 0x372   : > { %v464_v39 = vpop.f32.mrb[0].mxu1 }
 0x373   : > { %v470_v40 = vmul.f32 0.35355338, %v464_v39  ;;  %v1083_v41 = vpop.f32.mrb[1].mxu1 }
 0x374   : > { %v467_v42 = vpop.f32.mrb[2].mxu1 }
 0x375   : > { %v1084_v43 = vpop.f32.mrb[3].mxu1  ;;  %v472_v44 = vsel %vm471_vm3, -1e+09, %v470_v40 }
 0x376   : > { %v473_v45 = vsel %vm423_vm2, %v472_v44, -inf }
 0x377   : > { %474 = vmax.xlane.f32.xlu1 %v473_v45 }
 0x37a   : > { %v578_v46 = vpop.f32.mrb[4].mxu1 }
 0x37b   : > { %v584_v47 = vmul.f32 0.35355338, %v578_v46  ;;  %v1095_v48 = vpop.f32.mrb[5].mxu1 }
 0x37c   : > { %v581_v49 = vpop.f32.mrb[6].mxu1 }
 0x37d   : > { %v1096_v50 = vpop.f32.mrb[7].mxu1  ;;  %v585_v51 = vsel %vm471_vm3, -1e+09, %v584_v47 }
 0x37e   : > { %v586_v52 = vsel %vm423_vm2, %v585_v51, -inf }
 0x37f   : > { %587 = vmax.xlane.f32.xlu0 %v586_v52 }
 0x382   : > { %v690_v53 = vpop.f32.mrb[8].mxu1 }
 0x383   : > { %v696_v54 = vmul.f32 0.35355338, %v690_v53  ;;  %v1107_v55 = vpop.f32.mrb[9].mxu1 }
 0x384   : > { %v693_v56 = vpop.f32.mrb[10].mxu1 }
 0x385   : > { %v1108_v57 = vpop.f32.mrb[11].mxu1  ;;  %v697_v58 = vsel %vm471_vm3, -1e+09, %v696_v54 }
 0x386   : > { %v698_v59 = vsel %vm423_vm2, %v697_v58, -inf  ;;  %v1161_v57 = vld [vmem:[%s1390_s6] sm:$0xff]  }
 0x387   : > { %699 = vmax.xlane.f32.xlu1 %v698_v59  ;;  %1128 = vmatpush3.bf16.msra.mxu1 %v1161_v57 }
 0x388   : > { %1129 = vmatprep.subr.bf16.mxu1 %v1189_v8 }
 0x38a   : > { %v802_v60 = vpop.f32.mrb[12].mxu1 }
 0x38b   : > { %v808_v61 = vmul.f32 0.35355338, %v802_v60  ;;  %v1119_v62 = vpop.f32.mrb[13].mxu1 }
 0x38c   : > { %v805_v63 = vpop.f32.mrb[14].mxu1 }
 0x38d   : > { %v1120_v1 = vpop.f32.mrb[15].mxu1  ;;  %v809_v2 = vsel %vm471_vm3, -1e+09, %v808_v61 }
 0x38e   : > { %v810_v3 = vsel %vm423_vm2, %v809_v2, -inf }
 0x38f   : > { %811 = vmax.xlane.f32.xlu0 %v810_v3 }
 0x404   : > { %v475_v4 = vpop.xlane.xlu1 %474 }
 0x405   : > { %v476_v5 = vsub.f32 %v472_v44, %v475_v4 }
 0x407   : > { %v477_v6 = vmul.f32 1.442695, %v476_v5 }
 0x409   : > { %1165 = vpow2.f32 %v477_v6 }
 0x40c   : > { %v588_v7 = vpop.xlane.xlu0 %587 }
 0x40d   : > { %v589_v9 = vsub.f32 %v585_v51, %v588_v7 }
 0x40f   : > { %v590_v10 = vmul.f32 1.442695, %v589_v9 }
 0x411   : > { %1167 = vpow2.f32 %v590_v10 }
 0x413   : > { %v1166_v11 = vpop.eup %1165 }
 0x414   : > { %v479_v12 = vsel %vm423_vm2, %v1166_v11, 0.0  ;;  %v700_v20 = vpop.xlane.xlu1 %699 }
 0x415   : > { %480 = vadd.xlane.f32.xlu1 %v479_v12  ;;  %v701_v21 = vsub.f32 %v697_v58, %v700_v20  ;;  %v1162_v58 = vld [vmem:[%s1390_s6 + $0x8] sm:$0xff]  }
 0x416   : > { %1130 = vmatpush3.bf16.msra.mxu1 %v1162_v58 }
 0x417   : > { %v702_v22 = vmul.f32 1.442695, %v701_v21 }
 0x41b   : > { %v1168_v13 = vpop.eup %1167 }
 0x41c   : > { %v812_v14 = vpop.xlane.xlu0 %811  ;;  %v592_v15 = vsel %vm423_vm2, %v1168_v13, 0.0 }
 0x41d   : > { %v813_v16 = vsub.f32 %v809_v2, %v812_v14  ;;  %593 = vadd.xlane.f32.xlu0 %v592_v15 }
 0x41f   : > { %v814_v17 = vmul.f32 1.442695, %v813_v16 }
 0x421   : > { %1169 = vpow2.f32 %v814_v17 }
 0x422   : > { %1171 = vpow2.f32 %v702_v22 }
 0x426   : > { %485 = vrot.lane.b32.xlu1 %v1296_v25, %s1198_s11 }
 0x42b   : > { %v1170_v18 = vpop.eup %1169 }
 0x42c   : > { %v816_v19 = vsel %vm423_vm2, %v1170_v18, 0.0  ;;  %v1172_v23 = vpop.eup %1171 }
 0x42d   : > { %817 = vadd.xlane.f32.xlu0 %v816_v19  ;;  %v704_v24 = vsel %vm423_vm2, %v1172_v23, 0.0 }
 0x443   : > { %598 = vrot.lane.b32.xlu0 %v1296_v25, %s1199_s12 }
 0x44a   : > { %705 = vadd.xlane.f32.xlu1 %v704_v24 }
 0x45b   : > { %710 = vrot.lane.b32.xlu1 %v1296_v25, %s1200_s13 }
 0x45f   : > { %822 = vrot.lane.b32.xlu1 %v1296_v25, %s1201_s14 }
 0x4a2   : > { %v481_v26 = vpop.xlane.xlu1 %480 }
 0x4a3   : > { %1173 = vrcp.f32 %v481_v26 }
 0x4a6   : > { %v486_v27 = vpop.permute.xlu1 %485 }
 0x4a7   : > { %v492_v28 = vsel %vm490_vm4, %v486_v27, 0 }
 0x4a8   : > { %1086 = vmatpush3.bf16.msra.mxu0 %v492_v28 }
 0x4a9   : > { %1097 = vmatprep.subr.bf16.mxu0 %v1189_v8 }
 0x4aa   : > { %v594_v30 = vpop.xlane.xlu0 %593 }
 0x4ab   : > { %1175 = vrcp.f32 %v594_v30 }
 0x4ad   : > { %v1174_v29 = vpop.eup %1173 }
 0x4ae   : > { %v483_v31 = vmul.f32 %v1174_v29, %v1166_v11  ;;  %v1043_v11 = vld [vmem:[%s1391_s7] ss:$0 sm:$0xff] }
 0x4b0   : > { %v484_v32 = vpack.c.bf16 %v483_v31, %v483_v31 }
 0x4b2   : > { %1088 = vmatmul.mubr.msk.bf16.vlgmr.msra.gmra.mrb[4].mxu0 %vm423_vm2, %v484_v32 }
 0x4b3   : > { %1099 = vmatprep.mubr.msk.bf16.mxu0 %vm1190_vm1, %v1189_v8 }
 0x4b5   : > { %v1176_v25 = vpop.eup %1175 }
 0x4b6   : > { %v596_v34 = vmul.f32 %v1176_v25, %v1168_v13 }
 0x4b8   : > { %v597_v37 = vpack.c.bf16 %v596_v34, %v596_v34 }
 0x4ba   : > { %v818_v33 = vpop.xlane.xlu0 %817 }
 0x4be   : > { %v599_v35 = vpop.permute.xlu0 %598 }
 0x4bf   : > { %v604_v36 = vsel %vm490_vm4, %v599_v35, 0 }
 0x4c0   : > { %1098 = vmatpush3.bf16.msra.mxu0 %v604_v36 }
 0x4c1   : > { %1109 = vmatprep.subr.bf16.mxu0 %v1189_v8 }
 0x4c3   : > { %1100 = vmatmul.mubr.msk.bf16.vlgmr.msra.gmra.mrb[8].mxu0 %vm423_vm2, %v597_v37 }
 0x4c4   : > { %1111 = vmatprep.mubr.msk.bf16.mxu0 %vm1190_vm1, %v1189_v8 }
 0x4d7   : > { %v706_v38 = vpop.xlane.xlu1 %705 }
 0x4d8   : > { %1177 = vrcp.f32 %v706_v38 }
 0x4d9   : > { %1179 = vrcp.f32 %v818_v33 }
 0x4db   : > { %v711_v39 = vpop.permute.xlu1 %710 }
 0x4dc   : > { %v716_v40 = vsel %vm490_vm4, %v711_v39, 0 }
 0x4dd   : > { %1110 = vmatpush3.bf16.msra.mxu0 %v716_v40 }
 0x4de   : > { %1121 = vmatprep.subr.bf16.mxu0 %v1189_v8 }
 0x4df   : > { %v823_v43 = vpop.permute.xlu1 %822 }
 0x4e0   : > { %v828_v46 = vsel %vm490_vm4, %v823_v43, 0 }
 0x4e2   : > { %v1178_v41 = vpop.eup %1177 }
 0x4e3   : > { %v708_v42 = vmul.f32 %v1178_v41, %v1172_v23  ;;  %v1180_v45 = vpop.eup %1179 }
 0x4e4   : > { %v820_v47 = vmul.f32 %v1180_v45, %v1170_v18 }
 0x4e5   : > { %v709_v44 = vpack.c.bf16 %v708_v42, %v708_v42 }
 0x4e6   : > { %v821_v48 = vpack.c.bf16 %v820_v47, %v820_v47 }
 0x4e7   : > { %1112 = vmatmul.mubr.msk.bf16.vlgmr.msra.gmra.mrb[12].mxu0 %vm423_vm2, %v709_v44 }
 0x4e8   : > { %1122 = vmatpush3.bf16.msra.mxu0 %v828_v46  ;;  %1123 = vmatprep.mubr.msk.bf16.mxu0 %vm1190_vm1, %v1189_v8 }
 0x4ef   : > { %1124 = vmatmul.mubr.msk.bf16.vlgmr.msra.gmra.mrb[16].mxu0 %vm423_vm2, %v821_v48 }
 0x585   : > { %v528_v49 = vpop.f32.mrb[4].mxu0 }
 0x586   : > { %v1089_v50 = vpop.f32.mrb[5].mxu0 }
 0x587   : > { %v531_v51 = vpop.f32.mrb[6].mxu0 }
 0x588   : > { %v1090_v52 = vpop.f32.mrb[7].mxu0 }
 0x596   : > { %v640_v53 = vpop.f32.mrb[8].mxu0 }
 0x597   : > { %871 = vrot.lane.b32.xlu0 %v640_v53, %s1202_s15  ;;  %v1101_v54 = vpop.f32.mrb[9].mxu0 }
 0x598   : > { %v643_v55 = vpop.f32.mrb[10].mxu0 }
 0x599   : > { %v1102_v56 = vpop.f32.mrb[11].mxu0 }
 0x5ba   : > { %v752_v59 = vpop.f32.mrb[12].mxu0 }
 0x5bb   : > { %875 = vrot.lane.b32.xlu1 %v752_v59, %s1203_s20  ;;  %v1113_v60 = vpop.f32.mrb[13].mxu0 }
 0x5bc   : > { %v755_v61 = vpop.f32.mrb[14].mxu0 }
 0x5bd   : > { %v1114_v62 = vpop.f32.mrb[15].mxu0 }
 0x5c2   : > { %v864_v63 = vpop.f32.mrb[16].mxu0 }
 0x5c3   : > { %879 = vrot.lane.b32.xlu0 %v864_v63, %s1204_s21  ;;  %v1125_v1 = vpop.f32.mrb[17].mxu0 }
 0x5c4   : > { %v867_v2 = vpop.f32.mrb[18].mxu0 }
 0x5c5   : > { %v1126_v3 = vpop.f32.mrb[19].mxu0 }
 0x609   : > { %v872_v4 = vpop.permute.xlu0 %871 }
 0x60a   : > { %v882_v8 = vsel %vm423_vm2, %v528_v49, %v872_v4 }
 0x62d   : > { %v876_v5 = vpop.permute.xlu1 %875 }
 0x62e   : > { %v884_v6 = vsel %vm883_vm5, %v882_v8, %v876_v5 }
 0x635   : > { %v880_v7 = vpop.permute.xlu0 %879 }
 0x636   : > { %v886_v9 = vsel %vm885_vm6, %v884_v6, %v880_v7 }
 0x637   : > { %v887_v10 = vpack.c.bf16 %v886_v9, %v886_v9 }
 0x639   : > { %1132 = vmatmul.mubr.msk.bf16.vlgmr.msra.gmra.mrb[16].mxu1 %vm322_vm0, %v887_v10 }
 0x70c   : > { %v948_v12 = vpop.f32.mrb[16].mxu1 }
 0x70d   : > { %v949_v13 = vadd.f32 %v1043_v11, %v948_v12  ;;  %v1133_v14 = vpop.f32.mrb[17].mxu1 }
 0x70e   : > { %v951_v15 = vpop.f32.mrb[18].mxu1 }
 0x70f   : > { %v954_v16 = vadd.f32 %v949_v13, %v1264_v0  ;;  %v1134_v17 = vpop.f32.mrb[19].mxu1 }
 0x711   : > { %955 = vst.msk [vmem:[%s317_s26] sm:$0xff] %vm322_vm0, %v954_v16 }
 0x712 PF: > { %s18_s27 = sadd.s32 1, %s1187_s27  }
 0x713   : > { %p15_p4 = scmp.ge.s32.totalorder %s18_s27, 4  }
 0x715   :  { %17 = sbr.rel (!%p15_p4) target bundleno = 1 (0x1), region = 85 }

// kernel: decoder_forward.8
= control target key start
LH: loop header
LB: loop body
LE: loop exit
PB: predicated region body
PF: predicated region fallthrough
CT: control target
= control target key end

     0   :  { %s1454_s17 = smov 0   ;;  %s1605_s0 = inlined_call_operand.vmem [shape: f32[2,8,32], index: 0, kind: input, shape index: {}]   ;;  %s1606_s1 = inlined_call_operand.vmem [shape: f32[2,8,32], index: 1, kind: input, shape index: {}]   ;;  %s1607_s2 = inlined_call_operand.vmem [shape: s32[2,1,8], index: 2, kind: input, shape index: {}]   ;;  %s1608_s3 = inlined_call_operand.vmem [shape: f32[1,32], index: 3, kind: input, shape index: {}]   ;;  %s1609_s4 = inlined_call_operand.vmem [shape: f32[1,32], index: 4, kind: input, shape index: {}]   ;;  %s1610_s5 = inlined_call_operand.vmem [shape: bf16[32,32], index: 5, kind: input, shape index: {}]   ;;  %s1611_s6 = inlined_call_operand.vmem [shape: f32[1,32], index: 6, kind: input, shape index: {}]   ;;  %s1612_s7 = inlined_call_operand.vmem [shape: bf16[32,64], index: 7, kind: input, shape index: {}]   ;;  %s1613_s8 = inlined_call_operand.vmem [shape: f32[1,64], index: 8, kind: input, shape index: {}]   ;;  %s1614_s9 = inlined_call_operand.vmem [shape: bf16[32,32], index: 9, kind: input, shape index: {}]   ;;  %s1615_s10 = inlined_call_operand.vmem [shape: f32[1,32], index: 10, kind: input, shape index: {}]   ;;  %s1616_s11 = inlined_call_operand.vmem [shape: f32[2,8,32], index: 11, kind: output, shape index: {}]  }
   0x1 LB: > { %s1199_s18 = sadd.s32 4294967295, %s1379_s17   ;;  %p1203_p0 = scmp.ge.s32.totalorder %s1379_s17, 1  ;;  %s1379_s17 = sphi %s1454_s17, %s21_s17  }
   0x2   : > { %p353_p1 = scmp.lt.s32.totalorder %s1379_s17, 3 }
   0x4   : > { %p354_p2 = pnand %p1203_p0, %p353_p1 }
   0x5   : > { %p398_p3 = scmp.lt.s32.totalorder (!%p354_p2), %s1199_s18, 1  ;;  %vm418_vm0 = vcmask (!%p354_p2), 261120   ;;  %v1349_v7 = vld [vmem:[%s1612_s7] sm:$0xff] (!%p354_p2)   ;;  %v1381_v8 = vmov (!%p354_p2), 0.0   ;;  %v1350_v11 = vld [vmem:[%s1612_s7 + $0x8] sm:$0xff] (!%p354_p2)   ;;  %vm1382_vm1 = vmmov (!%p354_p2), 0   ;;  %v634_v48 = vlaneseq (!%p354_p2) }
   0x6   : > { %357 = sbr.rel (%p354_p2) target bundleno = 1795 (0x703), region = 64  ;;  %1264 = vmatprep.subr.bf16.mxu1 (!%p354_p2), %v1381_v8  ;;  %1256 = vmatprep.subr.bf16.mxu0 (!%p354_p2), %v1381_v8  ;;  %v1351_v9 = vld [vmem:[%s1610_s5] sm:$0xff] (!%p354_p2)   ;;  %v1352_v12 = vld [vmem:[%s1610_s5 + $0x8] sm:$0xff] (!%p354_p2)   ;;  %vm584_vm2 = vcmask (!%p354_p2), 64512   ;;  %s1383_s24 = smov (!%p354_p2), 120   ;;  %v1386_v52 = vmov (!%p354_p2), 0  }
   0x7   : > { %1265 = vmatpush3.bf16.msra.mxu1 (!%p354_p2), %v1349_v7  ;;  %1268 = vmatprep.mubr.msk.bf16.mxu1 (!%p354_p2), %vm1382_vm1, %v1381_v8  ;;  %v1207_v18 = vld [vmem:[%s1608_s3] ss:$0 sm:$0xff] (!%p354_p2)  ;;  %s1385_s28 = smov (!%p354_p2), 104   ;;  %v635_v50 = vshrl.u32 (!%p354_p2), %v634_v48, 7  ;;  %s1388_s13 = smov (!%p354_p2), 96   ;;  %vm658_vm5 = vcmask (!%p354_p2), 1043456  }
   0x8   : > { %1266 = vmatprep.subr.bf16.mxu1 (!%p354_p2), %v1381_v8  ;;  %1257 = vmatpush3.bf16.msra.mxu0 (!%p354_p2), %v1351_v9  ;;  %v1208_v20 = vld [vmem:[%s1609_s4] ss:$0 sm:$0xff] (!%p354_p2)  ;;  %s1389_s14 = smov (!%p354_p2), 72   ;;  %s1390_s15 = smov (!%p354_p2), 80   ;;  %vm1052_vm6 = vcmask (!%p354_p2), 130048   ;;  %vm1054_vm7 = vcmask (!%p354_p2), 195584  }
   0x9   : > { %1258 = vmatprep.subr.bf16.mxu0 (!%p354_p2), %v1381_v8  ;;  %1260 = vmatprep.mubr.msk.bf16.mxu0 (!%p354_p2), %vm1382_vm1, %v1381_v8  ;;  %v1213_v24 = vld [vmem:[%s1613_s8] ss:$0 sm:$0xff] (!%p354_p2)  ;;  %v636_v51 = vsub.s32 (!%p354_p2), 0, %v635_v50  ;;  %s1391_s16 = smov (!%p354_p2), 8  }
   0xa   : > { %v1209_v32 = vld [vmem:[%s1611_s6] ss:$0 sm:$0xff] (!%p354_p2) }
   0xb   : > { %1267 = vmatpush3.bf16.msra.mxu1 (!%p354_p2), %v1350_v11 }
   0xc   : > { %1259 = vmatpush3.bf16.msra.mxu0 (!%p354_p2), %v1352_v12  ;;  %1278 = vmatprep.subr.bf16.mxu1 (!%p354_p2), %v1381_v8 }
   0xd   : > { %s1618_s18 = smov (!%p398_p3, %s1199_s18), 1  ;;  %1272 = vmatprep.subr.bf16.mxu0 %v1381_v8 }
   0xe   : > { %s1465_s19 = sshll.u32 %s1618_s18, 3  ;;  %s408_s12 = scalar_lea.vmem %s1607_s2, %s1618_s18 }
   0xf   : > { %s401_s22 = scalar_lea.vmem %s1605_s0, %s1465_s19  ;;  %s405_s25 = scalar_lea.vmem %s1606_s1, %s1465_s19  ;;  %v581_v49 = vld [vmem:[%s408_s12] sm:$0x1] }
  0x10   : > { %v1471_v0 = vld [vmem:[%s401_s22] sm:$0xff]  ;;  %vm632_vm3 = vcmp.eq.s32.totalorder %v581_v49, 0  ;;  %s1387_s18 = smov 88   ;;  %s412_s30 = scalar_lea.vmem %s1616_s11, %s1465_s19 }
  0x11   : > { %v419_v1 = vsel %vm418_vm0, %v1471_v0, 0.0  ;;  %v415_v10 = vld [vmem:[%s405_s25] sm:$0xff]  ;;  %s1384_s25 = smov 112   ;;  %v633_v53 = vsel %vm632_vm3, 1, %v1386_v52 }
  0x12   : > { %420 = vadd.xlane.f32.xlu0 %v419_v1  ;;  %v514_v13 = vpack.c.bf16 %v415_v10, %v415_v10  ;;  %v637_v54 = vrot.slane %v633_v53, %v636_v51 }
  0x14   : > { %1269 = vmatmul.mubr.msk.bf16.vlgmr.msra.gmra.mrb[0].mxu1 %vm418_vm0, %v514_v13  ;;  %vm638_vm4 = vcmp.eq.s32.totalorder %v637_v54, 1 }
  0x15   : > { %1280 = vmatprep.mubr.msk.bf16.mxu1 %vm1382_vm1, %v1381_v8 }
  0x9f   : > { %v421_v2 = vpop.xlane.xlu0 %420 }
  0xa0   : > { %v423_v3 = vmul.f32 0.03125, %v421_v2 }
  0xa2   : > { %v424_v4 = vsub.f32 %v1471_v0, %v423_v3 }
  0xa4   : > { %v425_v5 = vmul.f32 %v424_v4, %v424_v4 }
  0xa6   : > { %v426_v6 = vsel %vm418_vm0, %v425_v5, 0.0 }
  0xa7   : > { %427 = vadd.xlane.f32.xlu0 %v426_v6 }
  0xe7   : > { %v575_v25 = vpop.f32.mrb[0].mxu1 }
  0xe8   : > { %v576_v26 = vadd.f32 %v1213_v24, %v575_v25  ;;  %v1270_v27 = vpop.f32.mrb[1].mxu1 }
  0xe9   : > { %v578_v28 = vpop.f32.mrb[2].mxu1 }
  0xea   : > { %v1518_v29 = vpack.c.bf16 %v576_v26, %v576_v26  ;;  %v1271_v30 = vpop.f32.mrb[3].mxu1 }
  0xec   : > { %705 = vrot.lane.b32.xlu1 %v1518_v29, %s1383_s24  ;;  %817 = vrot.lane.b32.xlu0 %v1518_v29, %s1384_s25  ;;  %v589_v31 = vsel %vm584_vm2, %v1518_v29, 0 }
 0x134   : > { %v428_v14 = vpop.xlane.xlu0 %427 }
 0x135   : > { %v429_v15 = vmul.f32 0.032258064, %v428_v14 }
 0x137   : > { %v430_v16 = vadd.f32 1e-06, %v429_v15 }
 0x139   : > { %1355 = vrsqrt.f32 %v430_v16 }
 0x143   : > { %v1356_v17 = vpop.eup %1355 }
 0x144   : > { %v432_v19 = vmul.f32 %v1356_v17, %v424_v4 }
 0x146   : > { %v439_v21 = vmul.f32 %v1207_v18, %v432_v19 }
 0x148   : > { %v446_v22 = vadd.f32 %v1208_v20, %v439_v21 }
 0x14a   : > { %v447_v23 = vpack.c.bf16 %v446_v22, %v446_v22 }
 0x14c   : > { %1261 = vmatmul.mubr.msk.bf16.vlgmr.msra.gmra.mrb[0].mxu0 %vm418_vm0, %v447_v23 }
 0x14d   : > { %1274 = vmatprep.mubr.msk.bf16.mxu0 %vm1382_vm1, %v1381_v8  ;;  %1273 = vmatpush3.bf16.xpose.msra.mxu0 %v589_v31 }
 0x14e   : > { %1284 = vmatprep.subr.bf16.mxu0 %v1381_v8 }
 0x15e   : > { %v706_v34 = vpop.permute.xlu1 %705  ;;  %v818_v41 = vpop.permute.xlu0 %817 }
 0x15f   : > { %v711_v40 = vsel %vm584_vm2, %v706_v34, 0  ;;  %v823_v43 = vsel %vm584_vm2, %v818_v41, 0 }
 0x21f   : > { %v508_v33 = vpop.f32.mrb[0].mxu0 }
 0x220   : > { %v509_v35 = vadd.f32 %v1209_v32, %v508_v33  ;;  %v1262_v36 = vpop.f32.mrb[1].mxu0 }
 0x221   : > { %v511_v37 = vpop.f32.mrb[2].mxu0 }
 0x222   : > { %v582_v38 = vpack.c.bf16 %v509_v35, %v509_v35  ;;  %v1263_v39 = vpop.f32.mrb[3].mxu0 }
 0x224   : > { %703 = vrot.lane.b32.xlu1 %v582_v38, %s1383_s24  ;;  %1275 = vmatmul.mubr.msk.bf16.vlgmr.msra.gmra.mrb[4].mxu0 %vm584_vm2, %v582_v38  ;;  %s1392_s24 = smov 16  }
 0x225   : > { %1285 = vmatpush3.bf16.xpose.msra.mxu0 %v711_v40  ;;  %1286 = vmatprep.mubr.msk.bf16.mxu0 %vm1382_vm1, %v1381_v8 }
 0x226   : > { %1296 = vmatprep.subr.bf16.mxu0 %v1381_v8 }
 0x228   : > { %815 = vrot.lane.b32.xlu1 %v582_v38, %s1384_s25  ;;  %s1393_s25 = smov 24  }
 0x22c   : > { %929 = vrot.lane.b32.xlu1 %v1518_v29, %s1385_s28 }
 0x230   : > { %927 = vrot.lane.b32.xlu1 %v582_v38, %s1385_s28 }
 0x296   : > { %v704_v42 = vpop.permute.xlu1 %703 }
 0x297   : > { %1287 = vmatmul.mubr.msk.bf16.vlgmr.msra.gmra.mrb[8].mxu0 %vm584_vm2, %v704_v42 }
 0x298   : > { %1297 = vmatpush3.bf16.xpose.msra.mxu0 %v823_v43  ;;  %1298 = vmatprep.mubr.msk.bf16.mxu0 %vm1382_vm1, %v1381_v8 }
 0x299   : > { %1308 = vmatprep.subr.bf16.mxu0 %v1381_v8 }
 0x29a   : > { %v816_v44 = vpop.permute.xlu1 %815 }
 0x29e   : > { %v930_v45 = vpop.permute.xlu1 %929 }
 0x29f   : > { %v935_v46 = vsel %vm584_vm2, %v930_v45, 0  ;;  %1299 = vmatmul.mubr.msk.bf16.vlgmr.msra.gmra.mrb[12].mxu0 %vm584_vm2, %v816_v44 }
 0x2a0   : > { %1309 = vmatpush3.bf16.xpose.msra.mxu0 %v935_v46  ;;  %1310 = vmatprep.mubr.msk.bf16.mxu0 %vm1382_vm1, %v1381_v8 }
 0x2a1   : > { %1320 = vmatprep.subr.bf16.mxu0 %v1381_v8 }
 0x2a2   : > { %v928_v47 = vpop.permute.xlu1 %927 }
 0x2a7   : > { %1311 = vmatmul.mubr.msk.bf16.vlgmr.msra.gmra.mrb[16].mxu0 %vm584_vm2, %v928_v47 }
 0x2a8   : > { %1324 = vmatprep.mubr.msk.bf16.mxu0 %vm1382_vm1, %v1381_v8 }
 0x2f7   : > { %v625_v55 = vpop.f32.mrb[4].mxu0 }
 0x2f8   : > { %v631_v56 = vmul.f32 0.35355338, %v625_v55  ;;  %v1276_v57 = vpop.f32.mrb[5].mxu0 }
 0x2f9   : > { %v628_v58 = vpop.f32.mrb[6].mxu0 }
 0x2fa   : > { %v1277_v59 = vpop.f32.mrb[7].mxu0  ;;  %v639_v60 = vsel %vm638_vm4, -1e+09, %v631_v56 }
 0x2fb   : > { %v640_v61 = vsel %vm584_vm2, %v639_v60, -inf }
 0x2fc   : > { %641 = vmax.xlane.f32.xlu1 %v640_v61 }
 0x36a   : > { %v747_v62 = vpop.f32.mrb[8].mxu0 }
 0x36b   : > { %v753_v63 = vmul.f32 0.35355338, %v747_v62  ;;  %v1288_v1 = vpop.f32.mrb[9].mxu0 }
 0x36c   : > { %v750_v2 = vpop.f32.mrb[10].mxu0 }
 0x36d   : > { %v1289_v3 = vpop.f32.mrb[11].mxu0  ;;  %v754_v4 = vsel %vm638_vm4, -1e+09, %v753_v63 }
 0x36e   : > { %v755_v5 = vsel %vm584_vm2, %v754_v4, -inf }
 0x36f   : > { %756 = vmax.xlane.f32.xlu0 %v755_v5 }
 0x372   : > { %v859_v6 = vpop.f32.mrb[12].mxu0 }
 0x373   : > { %v865_v7 = vmul.f32 0.35355338, %v859_v6  ;;  %v1300_v9 = vpop.f32.mrb[13].mxu0 }
 0x374   : > { %v862_v10 = vpop.f32.mrb[14].mxu0 }
 0x375   : > { %v1301_v11 = vpop.f32.mrb[15].mxu0  ;;  %v866_v12 = vsel %vm638_vm4, -1e+09, %v865_v7 }
 0x376   : > { %v867_v13 = vsel %vm584_vm2, %v866_v12, -inf  ;;  %v1353_v11 = vld [vmem:[%s1614_s9] sm:$0xff]  }
 0x377   : > { %868 = vmax.xlane.f32.xlu1 %v867_v13  ;;  %1321 = vmatpush3.bf16.msra.mxu0 %v1353_v11 }
 0x378   : > { %1322 = vmatprep.subr.bf16.mxu0 %v1381_v8 }
 0x37a   : > { %v971_v14 = vpop.f32.mrb[16].mxu0 }
 0x37b   : > { %v977_v15 = vmul.f32 0.35355338, %v971_v14  ;;  %v1312_v16 = vpop.f32.mrb[17].mxu0 }
 0x37c   : > { %v974_v17 = vpop.f32.mrb[18].mxu0 }
 0x37d   : > { %v1313_v18 = vpop.f32.mrb[19].mxu0  ;;  %v978_v19 = vsel %vm638_vm4, -1e+09, %v977_v15 }
 0x37e   : > { %v979_v20 = vsel %vm584_vm2, %v978_v19, -inf }
 0x37f   : > { %980 = vmax.xlane.f32.xlu1 %v979_v20 }
 0x389   : > { %v642_v21 = vpop.xlane.xlu1 %641 }
 0x38a   : > { %v643_v22 = vsub.f32 %v639_v60, %v642_v21 }
 0x38c   : > { %v644_v23 = vmul.f32 1.442695, %v643_v22 }
 0x38e   : > { %1357 = vpow2.f32 %v644_v23 }
 0x398   : > { %v1358_v24 = vpop.eup %1357 }
 0x399   : > { %v646_v25 = vsel %vm584_vm2, %v1358_v24, 0.0 }
 0x39a   : > { %647 = vadd.xlane.f32.xlu0 %v646_v25 }
 0x3fc   : > { %v757_v26 = vpop.xlane.xlu0 %756 }
 0x3fd   : > { %v758_v27 = vsub.f32 %v754_v4, %v757_v26 }
 0x3ff   : > { %v759_v28 = vmul.f32 1.442695, %v758_v27  ;;  %v1225_v27 = vld [vmem:[%s1615_s10] ss:$0 sm:$0xff] }
 0x401   : > { %1359 = vpow2.f32 %v759_v28 }
 0x404   : > { %v869_v30 = vpop.xlane.xlu1 %868 }
 0x405   : > { %v870_v31 = vsub.f32 %v866_v12, %v869_v30  ;;  %v1354_v12 = vld [vmem:[%s1614_s9 + $0x8] sm:$0xff]  }
 0x406   : > { %1323 = vmatpush3.bf16.msra.mxu0 %v1354_v12 }
 0x407   : > { %v871_v32 = vmul.f32 1.442695, %v870_v31 }
 0x409   : > { %1361 = vpow2.f32 %v871_v32 }
 0x40b   : > { %v1360_v33 = vpop.eup %1359 }
 0x40c   : > { %v761_v34 = vsel %vm584_vm2, %v1360_v33, 0.0  ;;  %v981_v37 = vpop.xlane.xlu1 %980 }
 0x40d   : > { %762 = vadd.xlane.f32.xlu1 %v761_v34  ;;  %v982_v38 = vsub.f32 %v978_v19, %v981_v37 }
 0x40f   : > { %v983_v39 = vmul.f32 1.442695, %v982_v38 }
 0x411   : > { %1363 = vpow2.f32 %v983_v39 }
 0x413   : > { %v1362_v35 = vpop.eup %1361 }
 0x414   : > { %v873_v36 = vsel %vm584_vm2, %v1362_v35, 0.0 }
 0x415   : > { %874 = vadd.xlane.f32.xlu0 %v873_v36 }
 0x41b   : > { %v1364_v40 = vpop.eup %1363 }
 0x41c   : > { %v985_v41 = vsel %vm584_vm2, %v1364_v40, 0.0 }
 0x41e   : > { %767 = vrot.lane.b32.xlu1 %v1518_v29, %s1387_s18 }
 0x427   : > { %v648_v42 = vpop.xlane.xlu0 %647 }
 0x428   : > { %1365 = vrcp.f32 %v648_v42 }
 0x42b   : > { %653 = vrot.lane.b32.xlu0 %v1518_v29, %s1388_s13 }
 0x42f   : > { %991 = vrot.lane.b32.xlu0 %v1518_v29, %s1389_s14 }
 0x432   : > { %v1366_v44 = vpop.eup %1365 }
 0x433   : > { %v650_v46 = vmul.f32 %v1366_v44, %v1358_v24 }
 0x435   : > { %v651_v50 = vpack.c.bf16 %v650_v46, %v650_v46 }
 0x442   : > { %986 = vadd.xlane.f32.xlu1 %v985_v41 }
 0x453   : > { %879 = vrot.lane.b32.xlu1 %v1518_v29, %s1390_s15 }
 0x49a   : > { %v763_v43 = vpop.xlane.xlu1 %762 }
 0x49b   : > { %1367 = vrcp.f32 %v763_v43 }
 0x49e   : > { %v768_v49 = vpop.permute.xlu1 %767 }
 0x49f   : > { %v773_v52 = vsel %vm658_vm5, %v768_v49, 0 }
 0x4a2   : > { %v875_v45 = vpop.xlane.xlu0 %874 }
 0x4a3   : > { %1369 = vrcp.f32 %v875_v45 }
 0x4a5   : > { %v1368_v51 = vpop.eup %1367 }
 0x4a6   : > { %v654_v47 = vpop.permute.xlu0 %653  ;;  %v765_v29 = vmul.f32 %v1368_v51, %v1360_v33 }
 0x4a7   : > { %v660_v48 = vsel %vm658_vm5, %v654_v47, 0 }
 0x4a8   : > { %1279 = vmatpush3.bf16.msra.mxu1 %v660_v48  ;;  %v766_v53 = vpack.c.bf16 %v765_v29, %v765_v29 }
 0x4a9   : > { %1290 = vmatprep.subr.bf16.mxu1 %v1381_v8 }
 0x4aa   : > { %v992_v59 = vpop.permute.xlu0 %991 }
 0x4ab   : > { %1281 = vmatmul.mubr.msk.bf16.vlgmr.msra.gmra.mrb[4].mxu1 %vm584_vm2, %v651_v50  ;;  %v997_v61 = vsel %vm658_vm5, %v992_v59, 0 }
 0x4ac   : > { %1291 = vmatpush3.bf16.msra.mxu1 %v773_v52  ;;  %1292 = vmatprep.mubr.msk.bf16.mxu1 %vm1382_vm1, %v1381_v8 }
 0x4ad   : > { %1302 = vmatprep.subr.bf16.mxu1 %v1381_v8  ;;  %v1370_v54 = vpop.eup %1369 }
 0x4ae   : > { %v877_v56 = vmul.f32 %v1370_v54, %v1362_v35 }
 0x4b0   : > { %v878_v60 = vpack.c.bf16 %v877_v56, %v877_v56 }
 0x4b3   : > { %1293 = vmatmul.mubr.msk.bf16.vlgmr.msra.gmra.mrb[8].mxu1 %vm584_vm2, %v766_v53 }
 0x4b4   : > { %1304 = vmatprep.mubr.msk.bf16.mxu1 %vm1382_vm1, %v1381_v8 }
 0x4cf   : > { %v987_v55 = vpop.xlane.xlu1 %986 }
 0x4d0   : > { %1371 = vrcp.f32 %v987_v55 }
 0x4d3   : > { %v880_v57 = vpop.permute.xlu1 %879 }
 0x4d4   : > { %v885_v58 = vsel %vm658_vm5, %v880_v57, 0 }
 0x4d5   : > { %1303 = vmatpush3.bf16.msra.mxu1 %v885_v58 }
 0x4d6   : > { %1314 = vmatprep.subr.bf16.mxu1 %v1381_v8 }
 0x4d8   : > { %1305 = vmatmul.mubr.msk.bf16.vlgmr.msra.gmra.mrb[12].mxu1 %vm584_vm2, %v878_v60 }
 0x4d9   : > { %1315 = vmatpush3.bf16.msra.mxu1 %v997_v61  ;;  %1316 = vmatprep.mubr.msk.bf16.mxu1 %vm1382_vm1, %v1381_v8 }
 0x4da   : > { %v1372_v62 = vpop.eup %1371 }
 0x4db   : > { %v989_v63 = vmul.f32 %v1372_v62, %v1364_v40 }
 0x4dd   : > { %v990_v1 = vpack.c.bf16 %v989_v63, %v989_v63 }
 0x4e0   : > { %1317 = vmatmul.mubr.msk.bf16.vlgmr.msra.gmra.mrb[16].mxu1 %vm584_vm2, %v990_v1 }
 0x57e   : > { %v696_v2 = vpop.f32.mrb[4].mxu1 }
 0x57f   : > { %v1282_v3 = vpop.f32.mrb[5].mxu1 }
 0x580   : > { %v699_v4 = vpop.f32.mrb[6].mxu1 }
 0x581   : > { %v1283_v5 = vpop.f32.mrb[7].mxu1 }
 0x586   : > { %v809_v6 = vpop.f32.mrb[8].mxu1 }
 0x587   : > { %1040 = vrot.lane.b32.xlu1 %v809_v6, %s1391_s16  ;;  %v1294_v7 = vpop.f32.mrb[9].mxu1 }
 0x588   : > { %v812_v9 = vpop.f32.mrb[10].mxu1 }
 0x589   : > { %v1295_v10 = vpop.f32.mrb[11].mxu1 }
 0x5ab   : > { %v921_v13 = vpop.f32.mrb[12].mxu1 }
 0x5ac   : > { %1044 = vrot.lane.b32.xlu0 %v921_v13, %s1392_s24  ;;  %v1306_v14 = vpop.f32.mrb[13].mxu1 }
 0x5ad   : > { %v924_v15 = vpop.f32.mrb[14].mxu1 }
 0x5ae   : > { %v1307_v16 = vpop.f32.mrb[15].mxu1 }
 0x5b3   : > { %v1033_v17 = vpop.f32.mrb[16].mxu1 }
 0x5b4   : > { %1048 = vrot.lane.b32.xlu1 %v1033_v17, %s1393_s25  ;;  %v1318_v18 = vpop.f32.mrb[17].mxu1 }
 0x5b5   : > { %v1036_v19 = vpop.f32.mrb[18].mxu1 }
 0x5b6   : > { %v1319_v20 = vpop.f32.mrb[19].mxu1 }
 0x5f9   : > { %v1041_v21 = vpop.permute.xlu1 %1040 }
 0x5fa   : > { %v1051_v22 = vsel %vm584_vm2, %v696_v2, %v1041_v21 }
 0x61e   : > { %v1045_v8 = vpop.permute.xlu0 %1044 }
 0x61f   : > { %v1053_v23 = vsel %vm1052_vm6, %v1051_v22, %v1045_v8 }
 0x626   : > { %v1049_v24 = vpop.permute.xlu1 %1048 }
 0x627   : > { %v1055_v25 = vsel %vm1054_vm7, %v1053_v23, %v1049_v24 }
 0x628   : > { %v1056_v26 = vpack.c.bf16 %v1055_v25, %v1055_v25 }
 0x62a   : > { %1325 = vmatmul.mubr.msk.bf16.vlgmr.msra.gmra.mrb[20].mxu0 %vm418_vm0, %v1056_v26 }
 0x6fd   : > { %v1117_v28 = vpop.f32.mrb[20].mxu0 }
 0x6fe   : > { %v1118_v30 = vadd.f32 %v1225_v27, %v1117_v28  ;;  %v1326_v31 = vpop.f32.mrb[21].mxu0 }
 0x6ff   : > { %v1120_v32 = vpop.f32.mrb[22].mxu0 }
 0x700   : > { %v1123_v33 = vadd.f32 %v1118_v30, %v1471_v0  ;;  %v1327_v34 = vpop.f32.mrb[23].mxu0 }
 0x702   : > { %1124 = vst.msk [vmem:[%s412_s30] sm:$0xff] %vm418_vm0, %v1123_v33 }
 0x703 PF: > { %s21_s17 = sadd.s32 1, %s1379_s17  }
 0x704   : > { %p18_p4 = scmp.ge.s32.totalorder %s21_s17, 4  }
 0x706   :  { %20 = sbr.rel (!%p18_p4) target bundleno = 1 (0x1), region = 100 }

</bundles_post_ra>
